<compile_context>
chip_gen: v5e
topology: v5e:2x2
jax: 0.10.0
libtpu: 0.0.40
codegen_flags: <defaults>
</compile_context>

<pallas_src>
import jax
import jax.numpy as jnp
from jax import lax
from jax.experimental import pallas as pl
from jax.experimental.pallas import tpu as pltpu


def _round_up(a, b):
    return (a + b - 1) // b * b


def _toeplitz_conv_weight(w, L):
    """PyTorch Conv1d weight (Cout, Cin, 3) -> banded matrix (L*Cin, L*Cout).

    T[lp*Cin + c, l*Cout + o] = w[o, c, lp - l + 1]  if 0 <= lp - l + 1 < 3,
    else 0 — so `x_flat @ T` (with x_flat[n, l*Cin + c] = x[n, c, l]) is the
    padding=1, kernel_size=3 convolution, boundary zero-padding included.
    """
    Cout, Cin, K = w.shape
    lp = jnp.arange(L)[:, None]
    l = jnp.arange(L)[None, :]
    k = lp - l + 1                                      # (L, L)
    valid = (k >= 0) & (k < K)
    k_c = jnp.clip(k, 0, K - 1)
    w_t = jnp.transpose(w, (2, 1, 0))                   # (K, Cin, Cout)
    T = w_t[k_c]                                        # (L, L, Cin, Cout)
    T = jnp.where(valid[:, :, None, None], T, 0.0)
    T = jnp.transpose(T, (0, 2, 1, 3))                  # (lp, c, l, o)
    return T.reshape(L * Cin, L * Cout)


def _conv_net_kernel(x_ref, w1_ref, b1_ref, w2e_ref, w2o_ref, b2_ref,
                     wf1_ref, bf1_ref, wf2_ref, bf2_ref, out_ref):
    """One grid step = B samples.  All operands bf16, accumulation f32.

    x_ref   : (B, L*Cin)        position-major / channel-minor input rows
    w1_ref  : (L*Cin, L*C1)     conv1 banded Toeplitz weights
    w2e_ref : (L*C1, Lp*C2)     conv2 Toeplitz weights, even output positions
    w2o_ref : (L*C1, Lp*C2)     conv2 Toeplitz weights, odd output positions
    wf1_ref : (Lp*C2, H)        fc1 weights in the kernel's flatten order
    wf2_ref : (H, n_out_pad)    fc2 weights, output padded to 128 lanes
    out_ref : (B, n_out_pad)
    """
    f32 = jnp.float32
    bf16 = jnp.bfloat16

    x = x_ref[...]                                                   # (B, L*Cin)

    # ---- conv1 (k=3, pad=1) as one banded matmul + bias + ReLU ----
    h1 = jnp.dot(x, w1_ref[...], preferred_element_type=f32)
    h1 = jnp.maximum(h1 + b1_ref[...], 0.0).astype(bf16)             # (B, L*C1)

    # ---- conv2 (k=3, pad=1) fused with ReLU + MaxPool1d(2) ----
    # maxpool(relu(conv2 + b2)) == relu(max(even, odd) + b2)
    h2e = jnp.dot(h1, w2e_ref[...], preferred_element_type=f32)
    h2o = jnp.dot(h1, w2o_ref[...], preferred_element_type=f32)
    pooled = jnp.maximum(jnp.maximum(h2e, h2o) + b2_ref[...], 0.0)
    pooled = pooled.astype(bf16)                                     # (B, Lp*C2)

    # TODO(synk): Dropout(0.5) is identity (eval mode); the training-mode
    # stochastic mask is not reproduced.

    # ---- fc1 + ReLU ----
    z = jnp.dot(pooled, wf1_ref[...], preferred_element_type=f32)
    z = jnp.maximum(z + bf1_ref[...], 0.0).astype(bf16)              # (B, H)

    # ---- fc2 (lane-dense padded output) ----
    y = jnp.dot(z, wf2_ref[...], preferred_element_type=f32) + bf2_ref[...]
    out_ref[...] = y.astype(out_ref.dtype)


def _pick_batch_block(n, block_b):
    """Samples per grid step: multiple of 8, low batch padding, grid >= 2 when
    the batch is big enough (feeds both v7x TensorCores)."""
    B = _round_up(min(block_b, _round_up(n, 8)), 8)
    while B > 8:
        waste = _round_up(n, B) - n
        if waste * 8 <= n:          # keep padding under ~12.5% of N
            break
        B = _round_up(max(8, B // 2), 8)
    if _round_up(n, B) // B < 2 and n >= 16:
        B = _round_up(max(8, -(-n // 2)), 8)   # split roughly in half
    return B


def conv_net_forward(x, params, *, block_b=256):
    """x: (N, Cin, L) float32, PyTorch NCL layout."""
    w1, b1, w2, b2, wf1, bf1, wf2, bf2 = params
    N, Cin, L = x.shape
    C1 = w1.shape[0]                     # 32
    C2 = w2.shape[0]                     # 64
    H = wf1.shape[0]
    n_out = wf2.shape[0]
    Lp = L // 2

    B = _pick_batch_block(N, block_b)
    N_pad = _round_up(N, B)
    n_out_pad = _round_up(n_out, 128)    # lane-dense output stores

    bf16 = jnp.bfloat16

    # x: (N, Cin, L) -> (N_pad, L*Cin) position-major / channel-minor rows.
    x_rows = jnp.transpose(x, (0, 2, 1)).reshape(N, L * Cin)
    x_rows = jnp.pad(x_rows, ((0, N_pad - N), (0, 0))).astype(bf16)

    # Conv weights -> banded Toeplitz matrices (zero padding built in).
    w1_t = _toeplitz_conv_weight(w1, L).astype(bf16)             # (L*Cin, L*C1)
    w2_t = _toeplitz_conv_weight(w2, L)                          # (L*C1, L*C2)
    w2_3 = w2_t.reshape(L * C1, L, C2)
    w2_even = w2_3[:, 0:2 * Lp:2, :].reshape(L * C1, Lp * C2).astype(bf16)
    w2_odd = w2_3[:, 1:2 * Lp:2, :].reshape(L * C1, Lp * C2).astype(bf16)

    # Biases tiled to the flat position-major layouts (kept in f32).
    b1_t = jnp.tile(b1, L).reshape(1, L * C1).astype(jnp.float32)
    b2_t = jnp.tile(b2, Lp).reshape(1, Lp * C2).astype(jnp.float32)

    # fc1: PyTorch flatten index is c*Lp + p; kernel flat index is p*C2 + c.
    wf1_p = jnp.transpose(wf1.reshape(H, C2, Lp), (2, 1, 0))
    wf1_p = wf1_p.reshape(Lp * C2, H).astype(bf16)
    bf1_r = bf1.reshape(1, H).astype(jnp.float32)

    # fc2: transpose and pad the output dim to a 128-lane multiple.
    wf2_p = jnp.pad(wf2.T, ((0, 0), (0, n_out_pad - n_out))).astype(bf16)
    bf2_p = jnp.pad(bf2, (0, n_out_pad - n_out)).reshape(1, n_out_pad)
    bf2_p = bf2_p.astype(jnp.float32)

    grid_spec = pltpu.PrefetchScalarGridSpec(
        num_scalar_prefetch=0,
        grid=(N_pad // B,),
        in_specs=[
            pl.BlockSpec((B, L * Cin), lambda n: (n, 0)),        # x rows
            pl.BlockSpec((L * Cin, L * C1), lambda n: (0, 0)),   # conv1 weights
            pl.BlockSpec((1, L * C1), lambda n: (0, 0)),         # conv1 bias
            pl.BlockSpec((L * C1, Lp * C2), lambda n: (0, 0)),   # conv2 even
            pl.BlockSpec((L * C1, Lp * C2), lambda n: (0, 0)),   # conv2 odd
            pl.BlockSpec((1, Lp * C2), lambda n: (0, 0)),        # conv2 bias
            pl.BlockSpec((Lp * C2, H), lambda n: (0, 0)),        # fc1 weights
            pl.BlockSpec((1, H), lambda n: (0, 0)),              # fc1 bias
            pl.BlockSpec((H, n_out_pad), lambda n: (0, 0)),      # fc2 weights
            pl.BlockSpec((1, n_out_pad), lambda n: (0, 0)),      # fc2 bias
        ],
        out_specs=pl.BlockSpec((B, n_out_pad), lambda n: (n, 0)),
    )

    out = pl.pallas_call(
        _conv_net_kernel,
        out_shape=jax.ShapeDtypeStruct((N_pad, n_out_pad), jnp.float32),
        grid_spec=grid_spec,
        compiler_params=pltpu.CompilerParams(
            dimension_semantics=("parallel",)),   # batch axis -> both TCs
    )(x_rows, w1_t, b1_t, w2_even, w2_odd, b2_t, wf1_p, bf1_r, wf2_p, bf2_p)
    return out[:N, :n_out]


def conv_net_reference(x, params):
    """Pure-JAX reference matching the PyTorch forward (eval mode)."""
    w1, b1, w2, b2, wf1, bf1, wf2, bf2 = params
    dn = ('NCH', 'OIH', 'NCH')
    h = lax.conv_general_dilated(x, w1, (1,), [(1, 1)], dimension_numbers=dn)
    h = jax.nn.relu(h + b1[None, :, None])
    h = lax.conv_general_dilated(h, w2, (1,), [(1, 1)], dimension_numbers=dn)
    h = jax.nn.relu(h + b2[None, :, None])
    N, C, L = h.shape
    h = jnp.max(h.reshape(N, C, L // 2, 2), axis=-1)    # MaxPool1d(2)
    flat = h.reshape(N, -1)                             # Flatten (channel-major)
    z = jax.nn.relu(flat @ wf1.T + bf1)
    return z @ wf2.T + bf2


if __name__ == "__main__":
    N, Cin, L, H, n_out = 2, 4, 16, 32, 10

    key = jax.random.PRNGKey(0)
    ks = jax.random.split(key, 9)
    params = (
        jax.random.normal(ks[0], (32, Cin, 3), jnp.float32) * 0.1,         # conv1.weight
        jax.random.normal(ks[1], (32,), jnp.float32) * 0.1,                # conv1.bias
        jax.random.normal(ks[2], (64, 32, 3), jnp.float32) * 0.1,          # conv2.weight
        jax.random.normal(ks[3], (64,), jnp.float32) * 0.1,                # conv2.bias
        jax.random.normal(ks[4], (H, 64 * (L // 2)), jnp.float32) * 0.05,  # fc1.weight
        jax.random.normal(ks[5], (H,), jnp.float32) * 0.1,                 # fc1.bias
        jax.random.normal(ks[6], (n_out, H), jnp.float32) * 0.1,           # fc2.weight
        jax.random.normal(ks[7], (n_out,), jnp.float32) * 0.1,             # fc2.bias
    )
    x = jax.random.normal(ks[8], (N, Cin, L), jnp.float32)

    y = conv_net_forward(x, params)
    y = jax.block_until_ready(y)

    y_ref = conv_net_reference(x, params)
    assert y.shape == (N, n_out)
    max_err = jnp.max(jnp.abs(y - y_ref))
    assert jnp.allclose(y, y_ref, atol=2e-2, rtol=2e-2), f"max abs err {max_err}"

    print("KERNEL_OK")
</pallas_src>

<mosaic_0001>
module attributes {stable_mosaic.version = 11 : i64} {
  func.func @_conv_net_kernel(%arg0: i32, %arg1: memref<8x64xbf16, #tpu.memory_space<vmem>>, %arg2: memref<64x512xbf16, #tpu.memory_space<vmem>>, %arg3: memref<1x512xf32, #tpu.memory_space<vmem>>, %arg4: memref<512x512xbf16, #tpu.memory_space<vmem>>, %arg5: memref<512x512xbf16, #tpu.memory_space<vmem>>, %arg6: memref<1x512xf32, #tpu.memory_space<vmem>>, %arg7: memref<512x32xbf16, #tpu.memory_space<vmem>>, %arg8: memref<1x32xf32, #tpu.memory_space<vmem>>, %arg9: memref<32x128xbf16, #tpu.memory_space<vmem>>, %arg10: memref<1x128xf32, #tpu.memory_space<vmem>>, %arg11: memref<8x128xf32, #tpu.memory_space<vmem>>) attributes {dimension_semantics = [#tpu.dimension_semantics<parallel>], iteration_bounds = array<i64: 1>, scalar_prefetch = 0 : i64, scratch_operands = 0 : i64, tpu.core_type = #tpu.core_type<tc>, window_params = [{transform_indices = @transform_0, window_bounds = array<i64: 8, 64>}, {pipeline_mode = #tpu.pipeline_mode<synchronous>, transform_indices = @transform_1, window_bounds = array<i64: 64, 512>}, {pipeline_mode = #tpu.pipeline_mode<synchronous>, transform_indices = @transform_2, window_bounds = array<i64: 1, 512>}, {pipeline_mode = #tpu.pipeline_mode<synchronous>, transform_indices = @transform_3, window_bounds = array<i64: 512, 512>}, {pipeline_mode = #tpu.pipeline_mode<synchronous>, transform_indices = @transform_4, window_bounds = array<i64: 512, 512>}, {pipeline_mode = #tpu.pipeline_mode<synchronous>, transform_indices = @transform_5, window_bounds = array<i64: 1, 512>}, {pipeline_mode = #tpu.pipeline_mode<synchronous>, transform_indices = @transform_6, window_bounds = array<i64: 512, 32>}, {pipeline_mode = #tpu.pipeline_mode<synchronous>, transform_indices = @transform_7, window_bounds = array<i64: 1, 32>}, {pipeline_mode = #tpu.pipeline_mode<synchronous>, transform_indices = @transform_8, window_bounds = array<i64: 32, 128>}, {pipeline_mode = #tpu.pipeline_mode<synchronous>, transform_indices = @transform_9, window_bounds = array<i64: 1, 128>}, {transform_indices = @transform_10, window_bounds = array<i64: 8, 128>}]} {
    %c0 = arith.constant 0 : index
    %c0_0 = arith.constant 0 : index
    %0 = vector.load %arg1[%c0, %c0_0] : memref<8x64xbf16, #tpu.memory_space<vmem>>, vector<8x64xbf16>
    %c0_1 = arith.constant 0 : index
    %c0_2 = arith.constant 0 : index
    %1 = vector.load %arg2[%c0_1, %c0_2] : memref<64x512xbf16, #tpu.memory_space<vmem>>, vector<64x512xbf16>
    %cst = arith.constant dense<0.000000e+00> : vector<8x512xf32>
    %2 = tpu.matmul %0, %1, %cst {dimension_numbers = #tpu.dot_dimension_numbers<[1], [0], [0], [1], [0, 0, 1, 1], [], []>} : vector<8x64xbf16>, vector<64x512xbf16>, vector<8x512xf32> -> vector<8x512xf32>
    %c0_3 = arith.constant 0 : index
    %c0_4 = arith.constant 0 : index
    %3 = vector.load %arg3[%c0_3, %c0_4] : memref<1x512xf32, #tpu.memory_space<vmem>>, vector<1x512xf32>
    %4 = vector.broadcast %3 : vector<1x512xf32> to vector<8x512xf32>
    %5 = arith.addf %2, %4 : vector<8x512xf32>
    %cst_5 = arith.constant 0.000000e+00 : f32
    %6 = vector.broadcast %cst_5 : f32 to vector<8x512xf32>
    %7 = arith.maximumf %5, %6 : vector<8x512xf32>
    %8 = arith.truncf %7 : vector<8x512xf32> to vector<8x512xbf16>
    %c0_6 = arith.constant 0 : index
    %c0_7 = arith.constant 0 : index
    %9 = vector.load %arg4[%c0_6, %c0_7] : memref<512x512xbf16, #tpu.memory_space<vmem>>, vector<512x512xbf16>
    %cst_8 = arith.constant dense<0.000000e+00> : vector<8x512xf32>
    %10 = tpu.matmul %8, %9, %cst_8 {dimension_numbers = #tpu.dot_dimension_numbers<[1], [0], [0], [1], [0, 0, 1, 1], [], []>} : vector<8x512xbf16>, vector<512x512xbf16>, vector<8x512xf32> -> vector<8x512xf32>
    %c0_9 = arith.constant 0 : index
    %c0_10 = arith.constant 0 : index
    %11 = vector.load %arg5[%c0_9, %c0_10] : memref<512x512xbf16, #tpu.memory_space<vmem>>, vector<512x512xbf16>
    %cst_11 = arith.constant dense<0.000000e+00> : vector<8x512xf32>
    %12 = tpu.matmul %8, %11, %cst_11 {dimension_numbers = #tpu.dot_dimension_numbers<[1], [0], [0], [1], [0, 0, 1, 1], [], []>} : vector<8x512xbf16>, vector<512x512xbf16>, vector<8x512xf32> -> vector<8x512xf32>
    %13 = arith.maximumf %10, %12 : vector<8x512xf32>
    %c0_12 = arith.constant 0 : index
    %c0_13 = arith.constant 0 : index
    %14 = vector.load %arg6[%c0_12, %c0_13] : memref<1x512xf32, #tpu.memory_space<vmem>>, vector<1x512xf32>
    %15 = vector.broadcast %14 : vector<1x512xf32> to vector<8x512xf32>
    %16 = arith.addf %13, %15 : vector<8x512xf32>
    %cst_14 = arith.constant 0.000000e+00 : f32
    %17 = vector.broadcast %cst_14 : f32 to vector<8x512xf32>
    %18 = arith.maximumf %16, %17 : vector<8x512xf32>
    %19 = arith.truncf %18 : vector<8x512xf32> to vector<8x512xbf16>
    %c0_15 = arith.constant 0 : index
    %c0_16 = arith.constant 0 : index
    %20 = vector.load %arg7[%c0_15, %c0_16] : memref<512x32xbf16, #tpu.memory_space<vmem>>, vector<512x32xbf16>
    %cst_17 = arith.constant dense<0.000000e+00> : vector<8x32xf32>
    %21 = tpu.matmul %19, %20, %cst_17 {dimension_numbers = #tpu.dot_dimension_numbers<[1], [0], [0], [1], [0, 0, 1, 1], [], []>} : vector<8x512xbf16>, vector<512x32xbf16>, vector<8x32xf32> -> vector<8x32xf32>
    %c0_18 = arith.constant 0 : index
    %c0_19 = arith.constant 0 : index
    %22 = vector.load %arg8[%c0_18, %c0_19] : memref<1x32xf32, #tpu.memory_space<vmem>>, vector<1x32xf32>
    %23 = vector.broadcast %22 : vector<1x32xf32> to vector<8x32xf32>
    %24 = arith.addf %21, %23 : vector<8x32xf32>
    %cst_20 = arith.constant 0.000000e+00 : f32
    %25 = vector.broadcast %cst_20 : f32 to vector<8x32xf32>
    %26 = arith.maximumf %24, %25 : vector<8x32xf32>
    %27 = arith.truncf %26 : vector<8x32xf32> to vector<8x32xbf16>
    %c0_21 = arith.constant 0 : index
    %c0_22 = arith.constant 0 : index
    %28 = vector.load %arg9[%c0_21, %c0_22] : memref<32x128xbf16, #tpu.memory_space<vmem>>, vector<32x128xbf16>
    %cst_23 = arith.constant dense<0.000000e+00> : vector<8x128xf32>
    %29 = tpu.matmul %27, %28, %cst_23 {dimension_numbers = #tpu.dot_dimension_numbers<[1], [0], [0], [1], [0, 0, 1, 1], [], []>} : vector<8x32xbf16>, vector<32x128xbf16>, vector<8x128xf32> -> vector<8x128xf32>
    %c0_24 = arith.constant 0 : index
    %c0_25 = arith.constant 0 : index
    %30 = vector.load %arg10[%c0_24, %c0_25] : memref<1x128xf32, #tpu.memory_space<vmem>>, vector<1x128xf32>
    %31 = vector.broadcast %30 : vector<1x128xf32> to vector<8x128xf32>
    %32 = arith.addf %29, %31 : vector<8x128xf32>
    %c0_26 = arith.constant 0 : index
    %c0_27 = arith.constant 0 : index
    %33 = vector.load %arg11[%c0_26, %c0_27] : memref<8x128xf32, #tpu.memory_space<vmem>>, vector<8x128xf32>
    tpu.vector_store %arg11[%c0_26, %c0_27], %32 {strides = array<i32>} : memref<8x128xf32, #tpu.memory_space<vmem>>, vector<8x128xf32>,
    return
  }
  func.func @transform_0(%arg0: i32) -> (i32, i32) {
    %c0_i32 = arith.constant 0 : i32
    %c0_i32_0 = arith.constant 0 : i32
    return %arg0, %c0_i32 : i32, i32
  }
  func.func @transform_1(%arg0: i32) -> (i32, i32) {
    %c0_i32 = arith.constant 0 : i32
    %c0_i32_0 = arith.constant 0 : i32
    %c0_i32_1 = arith.constant 0 : i32
    return %c0_i32, %c0_i32_0 : i32, i32
  }
  func.func @transform_2(%arg0: i32) -> (i32, i32) {
    %c0_i32 = arith.constant 0 : i32
    %c0_i32_0 = arith.constant 0 : i32
    %c0_i32_1 = arith.constant 0 : i32
    return %c0_i32, %c0_i32_0 : i32, i32
  }
  func.func @transform_3(%arg0: i32) -> (i32, i32) {
    %c0_i32 = arith.constant 0 : i32
    %c0_i32_0 = arith.constant 0 : i32
    %c0_i32_1 = arith.constant 0 : i32
    return %c0_i32, %c0_i32_0 : i32, i32
  }
  func.func @transform_4(%arg0: i32) -> (i32, i32) {
    %c0_i32 = arith.constant 0 : i32
    %c0_i32_0 = arith.constant 0 : i32
    %c0_i32_1 = arith.constant 0 : i32
    return %c0_i32, %c0_i32_0 : i32, i32
  }
  func.func @transform_5(%arg0: i32) -> (i32, i32) {
    %c0_i32 = arith.constant 0 : i32
    %c0_i32_0 = arith.constant 0 : i32
    %c0_i32_1 = arith.constant 0 : i32
    return %c0_i32, %c0_i32_0 : i32, i32
  }
  func.func @transform_6(%arg0: i32) -> (i32, i32) {
    %c0_i32 = arith.constant 0 : i32
    %c0_i32_0 = arith.constant 0 : i32
    %c0_i32_1 = arith.constant 0 : i32
    return %c0_i32, %c0_i32_0 : i32, i32
  }
  func.func @transform_7(%arg0: i32) -> (i32, i32) {
    %c0_i32 = arith.constant 0 : i32
    %c0_i32_0 = arith.constant 0 : i32
    %c0_i32_1 = arith.constant 0 : i32
    return %c0_i32, %c0_i32_0 : i32, i32
  }
  func.func @transform_8(%arg0: i32) -> (i32, i32) {
    %c0_i32 = arith.constant 0 : i32
    %c0_i32_0 = arith.constant 0 : i32
    %c0_i32_1 = arith.constant 0 : i32
    return %c0_i32, %c0_i32_0 : i32, i32
  }
  func.func @transform_9(%arg0: i32) -> (i32, i32) {
    %c0_i32 = arith.constant 0 : i32
    %c0_i32_0 = arith.constant 0 : i32
    %c0_i32_1 = arith.constant 0 : i32
    return %c0_i32, %c0_i32_0 : i32, i32
  }
  func.func @transform_10(%arg0: i32) -> (i32, i32) {
    %c0_i32 = arith.constant 0 : i32
    %c0_i32_0 = arith.constant 0 : i32
    return %arg0, %c0_i32 : i32, i32
  }
}

</mosaic_0001>

<bundles_post_ra>
// kernel: tpu_custom_call.1
= control target key start
LH: loop header
LB: loop body
LE: loop exit
PB: predicated region body
PF: predicated region fallthrough
CT: control target
= control target key end

     0   :  { %15 = vsyncpa [#allocation3], 0  ;;  %s4555_s0 = inlined_call_operand.vmem [shape: bf16[8,64], index: 0, kind: input, shape index: {}]   ;;  %s4556_s1 = inlined_call_operand.vmem [shape: bf16[64,512], index: 1, kind: input, shape index: {}]   ;;  %s4557_s2 = inlined_call_operand.vmem [shape: f32[1,512], index: 2, kind: input, shape index: {}]   ;;  %s4558_s3 = inlined_call_operand.hbm [shape: bf16[512,512], index: 3, kind: input, shape index: {}]   ;;  %s4559_s4 = inlined_call_operand.hbm [shape: bf16[512,512], index: 4, kind: input, shape index: {}]   ;;  %s4560_s5 = inlined_call_operand.vmem [shape: f32[1,512], index: 5, kind: input, shape index: {}]   ;;  %s4561_s6 = inlined_call_operand.vmem [shape: bf16[512,32], index: 6, kind: input, shape index: {}]   ;;  %s4562_s7 = inlined_call_operand.vmem [shape: f32[1,32], index: 7, kind: input, shape index: {}]   ;;  %s4563_s8 = inlined_call_operand.vmem [shape: bf16[32,128], index: 8, kind: input, shape index: {}]   ;;  %s4564_s9 = inlined_call_operand.vmem [shape: f32[1,128], index: 9, kind: input, shape index: {}]   ;;  %s4565_s10 = inlined_call_operand.hbm [shape: f32[8,128], index: 10, kind: output, shape index: {}]  }
   0x1   :  { %16 = vsyncpa [#allocation6], 0 }
   0x2   :  { %17 = vsyncpa [#allocation4], 0  ;;  %s28_s15 = sshll.u32 %s4558_s3, 4  ;;  %s4208_s16 = smov [#allocation2]   ;;  %s29_s15 = int_to_ptr.hbm [resolvable:$true] %s28_s15 }
   0x3   :  { %s30_s17 = sshll.u32 %s4208_s16, 4  ;;  %s41_s20 = sshll.u32 %s4559_s4, 4  ;;  %s31_s17 = int_to_ptr.vmem [resolvable:$true] %s30_s17  ;;  %s42_s20 = int_to_ptr.hbm [resolvable:$true] %s41_s20 }
   0x4   :  { %s4209_s21 = smov 256   ;;  %s4210_s22 = smov 16  }
   0x5   :  { %36 = dma.hbm_to_vmem [thread:$0]  %s29_s15, 16384, %s31_s17, [#allocation3], %s4209_s21, %s4209_s21, %s4210_s22  }
   0x6   :  { %s4211_s23 = smov [#allocation5]  }
   0x7   :  { %s43_s24 = sshll.u32 %s4211_s23, 4  ;;  %s44_s24 = int_to_ptr.vmem [resolvable:$true] %s43_s24 }
   0x8   :  { %49 = dma.hbm_to_vmem [thread:$0]  %s42_s20, 16384, %s44_s24, [#allocation6], %s4209_s21, %s4209_s21, %s4210_s22  }
   0x9   :  { %4202 = dma.done.wait [#allocation3], 16384  }
   0xa   :  { %4203 = vsyncadd [#allocation3], 4294950912 }
   0xb   :  { %4204 = dma.done.wait [#allocation6], 16384  }
   0xc   :  { %4205 = vsyncadd [#allocation6], 4294950912  ;;  %v2638_v0 = vld [vmem:[%s4556_s1 + $0x60] sm:$0xf]  ;;  %v3831_v1 = vld [vmem:[%s4556_s1 + $0x6c] sm:$0xf0] }
   0xd   :  { %v3829_v2 = vld [vmem:[%s4556_s1 + $0x64] sm:$0xf]  ;;  %v2639_v3 = vor.u32 %v3831_v1, %v2638_v0  ;;  %v2640_v4 = vld [vmem:[%s4556_s1 + $0x70] sm:$0xf0]  ;;  %v2646_v5 = vld [vmem:[%s4556_s1 + $0x68] sm:$0xf] }
   0xe   :  { %v3832_v6 = vld [vmem:[%s4556_s1 + $0x74] sm:$0xf0]  ;;  %v2643_v7 = vor.u32 %v3829_v2, %v2640_v4  ;;  %v3830_v9 = vld [vmem:[%s4556_s1 + $0x6c] sm:$0xf]  ;;  %v2648_v10 = vld [vmem:[%s4556_s1 + $0x78] sm:$0xf0] }
   0xf   :  { %v2647_v8 = vor.u32 %v3832_v6, %v2646_v5  ;;  %v2622_v11 = vld [vmem:[%s4556_s1 + $0x40] sm:$0xf]  ;;  %184 = vmatpush.bf16.msra.mxu0 %v2639_v3  ;;  %v2651_v12 = vor.u32 %v3830_v9, %v2648_v10  ;;  %v3827_v13 = vld [vmem:[%s4556_s1 + $0x4c] sm:$0xf0]  ;;  %v3825_v14 = vld [vmem:[%s4556_s1 + $0x44] sm:$0xf] }
  0x10   :  { %v2624_v15 = vld [vmem:[%s4556_s1 + $0x50] sm:$0xf0]  ;;  %197 = vmatpush.bf16.msra.mxu1 %v2643_v7  ;;  %v2623_v16 = vor.u32 %v3827_v13, %v2622_v11  ;;  %v2630_v18 = vld [vmem:[%s4556_s1 + $0x48] sm:$0xf]  ;;  %v3828_v19 = vld [vmem:[%s4556_s1 + $0x54] sm:$0xf0] }
  0x11   :  { %210 = vmatpush.bf16.msra.mxu2 %v2647_v8  ;;  %v2627_v17 = vor.u32 %v3825_v14, %v2624_v15  ;;  %v3826_v20 = vld [vmem:[%s4556_s1 + $0x4c] sm:$0xf]  ;;  %223 = vmatpush.bf16.msra.mxu3 %v2651_v12  ;;  %v2631_v21 = vor.u32 %v3828_v19, %v2630_v18  ;;  %v2632_v22 = vld [vmem:[%s4556_s1 + $0x58] sm:$0xf0]  ;;  %v2606_v23 = vld [vmem:[%s4556_s1 + $0x20] sm:$0xf] }
  0x12   :  { %v3823_v24 = vld [vmem:[%s4556_s1 + $0x2c] sm:$0xf0]  ;;  %v2635_v25 = vor.u32 %v3826_v20, %v2632_v22  ;;  %v3821_v26 = vld [vmem:[%s4556_s1 + $0x24] sm:$0xf]  ;;  %v2608_v27 = vld [vmem:[%s4556_s1 + $0x30] sm:$0xf0] }
  0x13   :  { %v2614_v28 = vld [vmem:[%s4556_s1 + $0x28] sm:$0xf]  ;;  %185 = vmatpush.bf16.msra.mxu0 %v2623_v16  ;;  %v2607_v29 = vor.u32 %v3823_v24, %v2606_v23  ;;  %v3824_v30 = vld [vmem:[%s4556_s1 + $0x34] sm:$0xf0]  ;;  %v3822_v31 = vld [vmem:[%s4556_s1 + $0x2c] sm:$0xf]  ;;  %v2611_v33 = vor.u32 %v3821_v26, %v2608_v27 }
  0x14   :  { %v2616_v32 = vld [vmem:[%s4556_s1 + $0x38] sm:$0xf0]  ;;  %198 = vmatpush.bf16.msra.mxu1 %v2627_v17  ;;  %v2615_v34 = vor.u32 %v3824_v30, %v2614_v28  ;;  %v2590_v35 = vld [vmem:[%s4556_s1] sm:$0xf]  ;;  %v3819_v36 = vld [vmem:[%s4556_s1 + $0xc] sm:$0xf0] }
  0x15   :  { %211 = vmatpush.bf16.msra.mxu2 %v2631_v21  ;;  %v3817_v37 = vld [vmem:[%s4556_s1 + $0x4] sm:$0xf]  ;;  %224 = vmatpush.bf16.msra.mxu3 %v2635_v25  ;;  %v2619_v38 = vor.u32 %v3822_v31, %v2616_v32  ;;  %v2592_v39 = vld [vmem:[%s4556_s1 + $0x10] sm:$0xf0]  ;;  %v2598_v40 = vld [vmem:[%s4556_s1 + $0x8] sm:$0xf]  ;;  %v2591_v44 = vor.u32 %v3819_v36, %v2590_v35 }
  0x16   :  { %v3820_v41 = vld [vmem:[%s4556_s1 + $0x14] sm:$0xf0]  ;;  %v3818_v42 = vld [vmem:[%s4556_s1 + $0xc] sm:$0xf]  ;;  %v2600_v43 = vld [vmem:[%s4556_s1 + $0x18] sm:$0xf0]  ;;  %v2595_v48 = vor.u32 %v3817_v37, %v2592_v39 }
  0x17   :  { %186 = vmatpush.bf16.msra.mxu0 %v2607_v29  ;;  %v2770_v45 = vld [vmem:[#allocation2 + $0xe0] sm:$0xf]  ;;  %v3863_v46 = vld [vmem:[#allocation2 + $0xec] sm:$0xf0]  ;;  %v2599_v49 = vor.u32 %v3820_v41, %v2598_v40  ;;  %vm176_vm0 = vcmask 523264   ;;  %v2603_v51 = vor.u32 %v3818_v42, %v2600_v43  ;;  %vm2552_vm1 = vcmask 261120  }
  0x18   :  { %v2898_v47 = vld [vmem:[#allocation2 + $0x1e0] sm:$0xf]  ;;  %199 = vmatpush.bf16.msra.mxu1 %v2611_v33  ;;  %v3895_v50 = vld [vmem:[#allocation2 + $0x1ec] sm:$0xf0]  ;;  %v2771_v52 = vor.u32 %v3863_v46, %v2770_v45 }
  0x19   :  { %212 = vmatpush.bf16.msra.mxu2 %v2615_v34  ;;  %225 = vmatpush.bf16.msra.mxu3 %v2619_v38  ;;  %v2754_v53 = vld [vmem:[#allocation2 + $0xc0] sm:$0xf]  ;;  %v3859_v54 = vld [vmem:[#allocation2 + $0xcc] sm:$0xf0]  ;;  %v2899_v56 = vor.u32 %v3895_v50, %v2898_v47 }
  0x1a   :  { %v3026_v55 = vld [vmem:[#allocation2 + $0x2e0] sm:$0xf]  ;;  %v3927_v57 = vld [vmem:[#allocation2 + $0x2ec] sm:$0xf0]  ;;  %v2755_v0 = vor.u32 %v3859_v54, %v2754_v53 }
  0x1b   :  { %v3154_v58 = vld [vmem:[#allocation2 + $0x3e0] sm:$0xf]  ;;  %v3959_v59 = vld [vmem:[#allocation2 + $0x3ec] sm:$0xf0]  ;;  %187 = vmatpush.bf16.msra.mxu0 %v2591_v44  ;;  %v3027_v63 = vor.u32 %v3927_v57, %v3026_v55 }
  0x1c   :  { %v69_v60 = vld [vmem:[%s4555_s0] sm:$0xf]  ;;  %v3891_v62 = vld [vmem:[#allocation2 + $0x1cc] sm:$0xf0]  ;;  %200 = vmatpush.bf16.msra.mxu1 %v2595_v48  ;;  %v3155_v1 = vor.u32 %v3959_v59, %v3154_v58 }
  0x1d   :  { %v2882_v61 = vld [vmem:[#allocation2 + $0x1c0] sm:$0xf]  ;;  %213 = vmatpush.bf16.msra.mxu2 %v2599_v49  ;;  %226 = vmatpush.bf16.msra.mxu3 %v2603_v51  ;;  %v3923_v4 = vld [vmem:[#allocation2 + $0x2cc] sm:$0xf0] }
  0x1e   :  { %v2738_v2 = vld [vmem:[#allocation2 + $0xa0] sm:$0xf]  ;;  %2652 = vmatmul.msk.bf16.vlgmr.msra.gmra.mxu0 %vm176_vm0, %v69_v60  ;;  %v2883_v5 = vor.u32 %v3891_v62, %v2882_v61  ;;  %v3855_v6 = vld [vmem:[#allocation2 + $0xac] sm:$0xf0] }
  0x1f   :  { %1008 = vmatpush.bf16.msrb.mxu0 %v2771_v52  ;;  %v3010_v3 = vld [vmem:[#allocation2 + $0x2c0] sm:$0xf]  ;;  %v3955_v8 = vld [vmem:[#allocation2 + $0x3cc] sm:$0xf0]  ;;  %2653 = vmatmul.msk.bf16.vlgmr.msra.gmra.mxu1 %vm176_vm0, %v69_v60  ;;  %v2739_v12 = vor.u32 %v3855_v6, %v2738_v2 }
  0x20   :  { %1021 = vmatpush.bf16.msrb.mxu1 %v2899_v56  ;;  %v3138_v7 = vld [vmem:[#allocation2 + $0x3c0] sm:$0xf]  ;;  %2654 = vmatmul.msk.bf16.vlgmr.msra.gmra.mxu2 %vm176_vm0, %v69_v60  ;;  %v3887_v10 = vld [vmem:[#allocation2 + $0x1ac] sm:$0xf0]  ;;  %v3011_v11 = vor.u32 %v3923_v4, %v3010_v3 }
  0x21   :  { %v2866_v9 = vld [vmem:[#allocation2 + $0x1a0] sm:$0xf]  ;;  %2655 = vmatmul.msk.bf16.vlgmr.msra.gmra.mxu3 %vm176_vm0, %v69_v60  ;;  %1034 = vmatpush.bf16.msrb.mxu2 %v3027_v63  ;;  %v3139_v13 = vor.u32 %v3955_v8, %v3138_v7  ;;  %v3919_v16 = vld [vmem:[#allocation2 + $0x2ac] sm:$0xf0]  ;;  %v3861_v7 = vld [vmem:[#allocation2 + $0xe4] sm:$0xf] }
  0x22   :  { %1047 = vmatpush.bf16.msrb.mxu3 %v3155_v1  ;;  %v2722_v14 = vld [vmem:[#allocation2 + $0x80] sm:$0xf]  ;;  %v2867_v17 = vor.u32 %v3887_v10, %v2866_v9  ;;  %v3851_v18 = vld [vmem:[#allocation2 + $0x8c] sm:$0xf0]  ;;  %v2772_v8 = vld [vmem:[#allocation2 + $0xf0] sm:$0xf0] }
  0x23   :  { %1009 = vmatpush.bf16.msrb.mxu0 %v2755_v0  ;;  %v2994_v15 = vld [vmem:[#allocation2 + $0x2a0] sm:$0xf]  ;;  %v3951_v20 = vld [vmem:[#allocation2 + $0x3ac] sm:$0xf0]  ;;  %v2723_v24 = vor.u32 %v3851_v18, %v2722_v14  ;;  %v3893_v9 = vld [vmem:[#allocation2 + $0x1e4] sm:$0xf] }
  0x24   :  { %1022 = vmatpush.bf16.msrb.mxu1 %v2883_v5  ;;  %v3122_v19 = vld [vmem:[#allocation2 + $0x3a0] sm:$0xf]  ;;  %v3883_v22 = vld [vmem:[#allocation2 + $0x18c] sm:$0xf0]  ;;  %v2995_v23 = vor.u32 %v3919_v16, %v2994_v15  ;;  %v2900_v10 = vld [vmem:[#allocation2 + $0x1f0] sm:$0xf0] }
  0x25   :  { %v2850_v21 = vld [vmem:[#allocation2 + $0x180] sm:$0xf]  ;;  %1035 = vmatpush.bf16.msrb.mxu2 %v3011_v11  ;;  %v3123_v25 = vor.u32 %v3951_v20, %v3122_v19  ;;  %v3915_v28 = vld [vmem:[#allocation2 + $0x28c] sm:$0xf0]  ;;  %v3857_v14 = vld [vmem:[#allocation2 + $0xc4] sm:$0xf]  ;;  %v2775_v19 = vor.u32 %v3861_v7, %v2772_v8 }
  0x26   :  { %1048 = vmatpush.bf16.msrb.mxu3 %v3139_v13  ;;  %v2706_v26 = vld [vmem:[#allocation2 + $0x60] sm:$0xf]  ;;  %v2851_v29 = vor.u32 %v3883_v22, %v2850_v21  ;;  %v3847_v30 = vld [vmem:[#allocation2 + $0x6c] sm:$0xf0]  ;;  %v3925_v21 = vld [vmem:[#allocation2 + $0x2e4] sm:$0xf] }
  0x27   :  { %1010 = vmatpush.bf16.msrb.mxu0 %v2739_v12  ;;  %v2978_v27 = vld [vmem:[#allocation2 + $0x280] sm:$0xf]  ;;  %v3947_v32 = vld [vmem:[#allocation2 + $0x38c] sm:$0xf0]  ;;  %v2707_v36 = vor.u32 %v3847_v30, %v2706_v26  ;;  %v3028_v22 = vld [vmem:[#allocation2 + $0x2f0] sm:$0xf0] }
  0x28   :  { %1023 = vmatpush.bf16.msrb.mxu1 %v2867_v17  ;;  %v3106_v31 = vld [vmem:[#allocation2 + $0x380] sm:$0xf]  ;;  %v3879_v34 = vld [vmem:[#allocation2 + $0x16c] sm:$0xf0]  ;;  %v2979_v35 = vor.u32 %v3915_v28, %v2978_v27  ;;  %v3156_v26 = vld [vmem:[#allocation2 + $0x3f0] sm:$0xf0] }
  0x29   :  { %v2834_v33 = vld [vmem:[#allocation2 + $0x160] sm:$0xf]  ;;  %1036 = vmatpush.bf16.msrb.mxu2 %v2995_v23  ;;  %v3107_v37 = vor.u32 %v3947_v32, %v3106_v31  ;;  %v3911_v40 = vld [vmem:[#allocation2 + $0x26c] sm:$0xf0]  ;;  %v2903_v23 = vor.u32 %v3893_v9, %v2900_v10  ;;  %v3889_v27 = vld [vmem:[#allocation2 + $0x1c4] sm:$0xf]  ;;  %v3031_v31 = vor.u32 %v3925_v21, %v3028_v22 }
  0x2a   :  { %1049 = vmatpush.bf16.msrb.mxu3 %v3123_v25  ;;  %v2690_v38 = vld [vmem:[#allocation2 + $0x40] sm:$0xf]  ;;  %v2835_v41 = vor.u32 %v3879_v34, %v2834_v33  ;;  %v3843_v42 = vld [vmem:[#allocation2 + $0x4c] sm:$0xf0]  ;;  %v3957_v25 = vld [vmem:[#allocation2 + $0x3e4] sm:$0xf] }
  0x2b   :  { %1011 = vmatpush.bf16.msrb.mxu0 %v2723_v24  ;;  %v2962_v39 = vld [vmem:[#allocation2 + $0x260] sm:$0xf]  ;;  %v3943_v44 = vld [vmem:[#allocation2 + $0x36c] sm:$0xf0]  ;;  %v2691_v48 = vor.u32 %v3843_v42, %v2690_v38  ;;  %v2756_v24 = vld [vmem:[#allocation2 + $0xd0] sm:$0xf0] }
  0x2c   :  { %1024 = vmatpush.bf16.msrb.mxu1 %v2851_v29  ;;  %v3090_v43 = vld [vmem:[#allocation2 + $0x360] sm:$0xf]  ;;  %v3875_v46 = vld [vmem:[#allocation2 + $0x14c] sm:$0xf0]  ;;  %v2963_v47 = vor.u32 %v3911_v40, %v2962_v39  ;;  %v2884_v28 = vld [vmem:[#allocation2 + $0x1d0] sm:$0xf0]  ;;  %v2759_v34 = vor.u32 %v3857_v14, %v2756_v24 }
  0x2d   :  { %v2818_v45 = vld [vmem:[#allocation2 + $0x140] sm:$0xf]  ;;  %1037 = vmatpush.bf16.msrb.mxu2 %v2979_v35  ;;  %v3091_v49 = vor.u32 %v3943_v44, %v3090_v43  ;;  %v3907_v52 = vld [vmem:[#allocation2 + $0x24c] sm:$0xf0]  ;;  %v3853_v32 = vld [vmem:[#allocation2 + $0xa4] sm:$0xf]  ;;  %v3159_v35 = vor.u32 %v3957_v25, %v3156_v26 }
  0x2e   :  { %1050 = vmatpush.bf16.msrb.mxu3 %v3107_v37  ;;  %v2674_v50 = vld [vmem:[#allocation2 + $0x20] sm:$0xf]  ;;  %v2819_v53 = vor.u32 %v3875_v46, %v2818_v45  ;;  %v3839_v54 = vld [vmem:[#allocation2 + $0x2c] sm:$0xf0]  ;;  %v3921_v33 = vld [vmem:[#allocation2 + $0x2c4] sm:$0xf]  ;;  %v2887_v37 = vor.u32 %v3889_v27, %v2884_v28 }
  0x2f   :  { %1012 = vmatpush.bf16.msrb.mxu0 %v2707_v36  ;;  %v2946_v51 = vld [vmem:[#allocation2 + $0x240] sm:$0xf]  ;;  %v3939_v56 = vld [vmem:[#allocation2 + $0x34c] sm:$0xf0]  ;;  %v2675_v61 = vor.u32 %v3839_v54, %v2674_v50  ;;  %v3012_v36 = vld [vmem:[#allocation2 + $0x2d0] sm:$0xf0] }
  0x30   :  { %1025 = vmatpush.bf16.msrb.mxu1 %v2835_v41  ;;  %v3074_v55 = vld [vmem:[#allocation2 + $0x340] sm:$0xf]  ;;  %v3871_v58 = vld [vmem:[#allocation2 + $0x12c] sm:$0xf0]  ;;  %v2947_v59 = vor.u32 %v3907_v52, %v2946_v51  ;;  %v2740_v38 = vld [vmem:[#allocation2 + $0xb0] sm:$0xf0]  ;;  %v3015_v43 = vor.u32 %v3921_v33, %v3012_v36 }
  0x31   :  { %v2802_v57 = vld [vmem:[#allocation2 + $0x120] sm:$0xf]  ;;  %1038 = vmatpush.bf16.msrb.mxu2 %v2963_v47  ;;  %v3075_v62 = vor.u32 %v3939_v56, %v3074_v55  ;;  %v3835_v63 = vld [vmem:[#allocation2 + $0xc] sm:$0xf0]  ;;  %v3953_v39 = vld [vmem:[#allocation2 + $0x3c4] sm:$0xf]  ;;  %v2743_v44 = vor.u32 %v3853_v32, %v2740_v38 }
  0x32   :  { %v2658_v60 = vld [vmem:[#allocation2] sm:$0xf]  ;;  %1051 = vmatpush.bf16.msrb.mxu3 %v3091_v49  ;;  %v3903_v1 = vld [vmem:[#allocation2 + $0x22c] sm:$0xf0]  ;;  %v2803_v2 = vor.u32 %v3871_v58, %v2802_v57  ;;  %v3140_v40 = vld [vmem:[#allocation2 + $0x3d0] sm:$0xf0] }
  0x33   :  { %1013 = vmatpush.bf16.msrb.mxu0 %v2691_v48  ;;  %v2930_v0 = vld [vmem:[#allocation2 + $0x220] sm:$0xf]  ;;  %v3935_v5 = vld [vmem:[#allocation2 + $0x32c] sm:$0xf0]  ;;  %v2659_v12 = vor.u32 %v3835_v63, %v2658_v60  ;;  %v3885_v41 = vld [vmem:[#allocation2 + $0x1a4] sm:$0xf]  ;;  %v3143_v45 = vor.u32 %v3953_v39, %v3140_v40 }
  0x34   :  { %1026 = vmatpush.bf16.msrb.mxu1 %v2819_v53  ;;  %v2786_v3 = vld [vmem:[#allocation2 + $0x100] sm:$0xf]  ;;  %v3867_v6 = vld [vmem:[#allocation2 + $0x10c] sm:$0xf0]  ;;  %v2931_v11 = vor.u32 %v3903_v1, %v2930_v0  ;;  %v2868_v42 = vld [vmem:[#allocation2 + $0x1b0] sm:$0xf0] }
  0x35   :  { %v3058_v4 = vld [vmem:[#allocation2 + $0x320] sm:$0xf]  ;;  %1039 = vmatpush.bf16.msrb.mxu2 %v2947_v59  ;;  %v3899_v16 = vld [vmem:[#allocation2 + $0x20c] sm:$0xf0]  ;;  %v2787_v18 = vor.u32 %v3867_v6, %v2786_v3  ;;  %v3849_v46 = vld [vmem:[#allocation2 + $0x84] sm:$0xf]  ;;  %v2871_v49 = vor.u32 %v3885_v41, %v2868_v42 }
  0x36   :  { %1052 = vmatpush.bf16.msrb.mxu3 %v3075_v62  ;;  %v3059_v13 = vor.u32 %v3935_v5, %v3058_v4  ;;  %v2914_v15 = vld [vmem:[#allocation2 + $0x200] sm:$0xf]  ;;  %v3931_v20 = vld [vmem:[#allocation2 + $0x30c] sm:$0xf0]  ;;  %v3917_v47 = vld [vmem:[#allocation2 + $0x2a4] sm:$0xf] }
  0x37   :  { %1014 = vmatpush.bf16.msrb.mxu0 %v2675_v61  ;;  %v3042_v17 = vld [vmem:[#allocation2 + $0x300] sm:$0xf]  ;;  %v2915_v29 = vor.u32 %v3899_v16, %v2914_v15  ;;  %v2996_v48 = vld [vmem:[#allocation2 + $0x2b0] sm:$0xf0]  ;;  %v3949_v51 = vld [vmem:[#allocation2 + $0x3a4] sm:$0xf] }
  0x38   :  { %1027 = vmatpush.bf16.msrb.mxu1 %v2803_v2  ;;  %v3043_v30 = vor.u32 %v3931_v20, %v3042_v17  ;;  %v2724_v50 = vld [vmem:[#allocation2 + $0x90] sm:$0xf0]  ;;  %v3881_v53 = vld [vmem:[#allocation2 + $0x184] sm:$0xf]  ;;  %v2999_v55 = vor.u32 %v3917_v47, %v2996_v48 }
  0x39   :  { %1040 = vmatpush.bf16.msrb.mxu2 %v2931_v11  ;;  %v3124_v52 = vld [vmem:[#allocation2 + $0x3b0] sm:$0xf0]  ;;  %v2727_v56 = vor.u32 %v3849_v46, %v2724_v50  ;;  %v3845_v58 = vld [vmem:[#allocation2 + $0x64] sm:$0xf] }
  0x3a   :  { %1053 = vmatpush.bf16.msrb.mxu3 %v3059_v13  ;;  %v2852_v54 = vld [vmem:[#allocation2 + $0x190] sm:$0xf0]  ;;  %v3127_v57 = vor.u32 %v3949_v51, %v3124_v52  ;;  %v3913_v59 = vld [vmem:[#allocation2 + $0x284] sm:$0xf] }
  0x3b   :  { %1015 = vmatpush.bf16.msrb.mxu0 %v2659_v12  ;;  %v2980_v60 = vld [vmem:[#allocation2 + $0x290] sm:$0xf0]  ;;  %v2855_v61 = vor.u32 %v3881_v53, %v2852_v54  ;;  %v3945_v63 = vld [vmem:[#allocation2 + $0x384] sm:$0xf] }
  0x3c   :  { %1028 = vmatpush.bf16.msrb.mxu1 %v2787_v18  ;;  %v2708_v62 = vld [vmem:[#allocation2 + $0x70] sm:$0xf0]  ;;  %v3877_v1 = vld [vmem:[#allocation2 + $0x164] sm:$0xf]  ;;  %v2983_v3 = vor.u32 %v3913_v59, %v2980_v60  ;;  %v3896_v59 = vld [vmem:[#allocation2 + $0x1f4] sm:$0xf0] }
  0x3d   :  { %1041 = vmatpush.bf16.msrb.mxu2 %v2915_v29  ;;  %v3108_v0 = vld [vmem:[#allocation2 + $0x390] sm:$0xf0]  ;;  %v2711_v4 = vor.u32 %v3845_v58, %v2708_v62  ;;  %v3841_v7 = vld [vmem:[#allocation2 + $0x44] sm:$0xf]  ;;  %v2906_v58 = vld [vmem:[#allocation2 + $0x1e8] sm:$0xf] }
  0x3e   :  { %1054 = vmatpush.bf16.msrb.mxu3 %v3043_v30  ;;  %v2836_v2 = vld [vmem:[#allocation2 + $0x170] sm:$0xf0]  ;;  %v3111_v5 = vor.u32 %v3945_v63, %v3108_v0  ;;  %v3873_v9 = vld [vmem:[#allocation2 + $0x144] sm:$0xf] }
  0x3f   :  { %1060 = vmatpush.bf16.msra.mxu0 %v2775_v19  ;;  %v2839_v6 = vor.u32 %v3877_v1, %v2836_v2  ;;  %v2692_v8 = vld [vmem:[#allocation2 + $0x50] sm:$0xf0]  ;;  %v3909_v13 = vld [vmem:[#allocation2 + $0x264] sm:$0xf]  ;;  %v2907_v2 = vor.u32 %v3896_v59, %v2906_v58 }
  0x40   :  { %1073 = vmatpush.bf16.msra.mxu1 %v2903_v23  ;;  %v2820_v10 = vld [vmem:[#allocation2 + $0x150] sm:$0xf0]  ;;  %v2695_v11 = vor.u32 %v3841_v7, %v2692_v8  ;;  %v3941_v15 = vld [vmem:[#allocation2 + $0x364] sm:$0xf]  ;;  %v3892_v7 = vld [vmem:[#allocation2 + $0x1d4] sm:$0xf0] }
  0x41   :  { %1086 = vmatpush.bf16.msra.mxu2 %v3031_v31  ;;  %v2823_v12 = vor.u32 %v3873_v9, %v2820_v10  ;;  %v2964_v14 = vld [vmem:[#allocation2 + $0x270] sm:$0xf0]  ;;  %v3837_v19 = vld [vmem:[#allocation2 + $0x24] sm:$0xf] }
  0x42   :  { %1099 = vmatpush.bf16.msra.mxu3 %v3159_v35  ;;  %v2967_v16 = vor.u32 %v3909_v13, %v2964_v14  ;;  %v3092_v17 = vld [vmem:[#allocation2 + $0x370] sm:$0xf0]  ;;  %v3869_v22 = vld [vmem:[#allocation2 + $0x124] sm:$0xf]  ;;  %v3034_v13 = vld [vmem:[#allocation2 + $0x2e8] sm:$0xf] }
  0x43   :  { %1061 = vmatpush.bf16.msra.mxu0 %v2759_v34  ;;  %v3095_v18 = vor.u32 %v3941_v15, %v3092_v17  ;;  %v2676_v20 = vld [vmem:[#allocation2 + $0x30] sm:$0xf0]  ;;  %v3905_v25 = vld [vmem:[#allocation2 + $0x244] sm:$0xf]  ;;  %v3928_v14 = vld [vmem:[#allocation2 + $0x2f4] sm:$0xf0] }
  0x44   :  { %1074 = vmatpush.bf16.msra.mxu1 %v2887_v37  ;;  %v2679_v21 = vor.u32 %v3837_v19, %v2676_v20  ;;  %v2804_v23 = vld [vmem:[#allocation2 + $0x130] sm:$0xf0]  ;;  %v3937_v27 = vld [vmem:[#allocation2 + $0x344] sm:$0xf]  ;;  %v3162_v15 = vld [vmem:[#allocation2 + $0x3e8] sm:$0xf] }
  0x45   :  { %1087 = vmatpush.bf16.msra.mxu2 %v3015_v43  ;;  %v2807_v24 = vor.u32 %v3869_v22, %v2804_v23  ;;  %v2948_v26 = vld [vmem:[#allocation2 + $0x250] sm:$0xf0]  ;;  %v3833_v31 = vld [vmem:[#allocation2 + $0x4] sm:$0xf]  ;;  %v3960_v19 = vld [vmem:[#allocation2 + $0x3f4] sm:$0xf0] }
  0x46   :  { %1100 = vmatpush.bf16.msra.mxu3 %v3143_v45  ;;  %v2951_v28 = vor.u32 %v3905_v25, %v2948_v26  ;;  %v3076_v29 = vld [vmem:[#allocation2 + $0x350] sm:$0xf0]  ;;  %v3865_v33 = vld [vmem:[#allocation2 + $0x104] sm:$0xf]  ;;  %v2746_v20 = vld [vmem:[#allocation2 + $0xa8] sm:$0xf]  ;;  %v3035_v26 = vor.u32 %v3928_v14, %v3034_v13 }
  0x47   :  { %1062 = vmatpush.bf16.msra.mxu0 %v2743_v44  ;;  %v3079_v30 = vor.u32 %v3937_v27, %v3076_v29  ;;  %v2660_v32 = vld [vmem:[#allocation2 + $0x10] sm:$0xf0]  ;;  %v3901_v37 = vld [vmem:[#allocation2 + $0x224] sm:$0xf]  ;;  %v2874_v23 = vld [vmem:[#allocation2 + $0x1a8] sm:$0xf] }
  0x48   :  { %1075 = vmatpush.bf16.msra.mxu1 %v2871_v49  ;;  %v2663_v34 = vor.u32 %v3833_v31, %v2660_v32  ;;  %v2788_v35 = vld [vmem:[#allocation2 + $0x110] sm:$0xf0]  ;;  %v3933_v40 = vld [vmem:[#allocation2 + $0x324] sm:$0xf]  ;;  %v86_v49 = vld [vmem:[%s4557_s2] sm:$0xf] }
  0x49   :  { %1088 = vmatpush.bf16.msra.mxu2 %v2999_v55  ;;  %v2791_v36 = vor.u32 %v3865_v33, %v2788_v35  ;;  %v2932_v38 = vld [vmem:[#allocation2 + $0x230] sm:$0xf0]  ;;  %v3897_v43 = vld [vmem:[#allocation2 + $0x204] sm:$0xf]  ;;  %v88_v50 = vperm.slane %v86_v49, 0  ;;  %v89_v51 = vperm.slane %v86_v49, 1 }
  0x4a   :  { %1101 = vmatpush.bf16.msra.mxu3 %v3127_v57  ;;  %v2935_v39 = vor.u32 %v3901_v37, %v2932_v38  ;;  %v3060_v41 = vld [vmem:[#allocation2 + $0x330] sm:$0xf0]  ;;  %v3929_v46 = vld [vmem:[#allocation2 + $0x304] sm:$0xf]  ;;  %v2778_v55 = vld [vmem:[#allocation2 + $0xe8] sm:$0xf] }
  0x4b   :  { %1063 = vmatpush.bf16.msra.mxu0 %v2727_v56  ;;  %v3063_v42 = vor.u32 %v3933_v40, %v3060_v41  ;;  %v2916_v44 = vld [vmem:[#allocation2 + $0x210] sm:$0xf0]  ;;  %v3864_v56 = vld [vmem:[#allocation2 + $0xf4] sm:$0xf0]  ;;  %v90_v62 = vperm.slane %v86_v49, 2  ;;  %v91_v1 = vperm.slane %v86_v49, 3 }
  0x4c   :  { %1076 = vmatpush.bf16.msra.mxu1 %v2855_v61  ;;  %v2919_v45 = vor.u32 %v3897_v43, %v2916_v44  ;;  %v3044_v47 = vld [vmem:[#allocation2 + $0x310] sm:$0xf0]  ;;  %v2779_v63 = vor.u32 %v3864_v56, %v2778_v55  ;;  %v3924_v31 = vld [vmem:[#allocation2 + $0x2d4] sm:$0xf0]  ;;  %v3146_v32 = vld [vmem:[#allocation2 + $0x3c8] sm:$0xf] }
  0x4d   :  { %1089 = vmatpush.bf16.msra.mxu2 %v2983_v3  ;;  %v3047_v48 = vor.u32 %v3929_v46, %v3044_v47  ;;  %v2762_v3 = vld [vmem:[#allocation2 + $0xc8] sm:$0xf]  ;;  %v3956_v35 = vld [vmem:[#allocation2 + $0x3d4] sm:$0xf0] }
  0x4e   :  { %1102 = vmatpush.bf16.msra.mxu3 %v3111_v5  ;;  %v3852_v37 = vld [vmem:[#allocation2 + $0x94] sm:$0xf0]  ;;  %v2858_v38 = vld [vmem:[#allocation2 + $0x188] sm:$0xf]  ;;  %v3147_v43 = vor.u32 %v3956_v35, %v3146_v32  ;;  %v3894_v32 = vld [vmem:[#allocation2 + $0x1ec] sm:$0xf] }
  0x4f   :  { %1064 = vmatpush.bf16.msra.mxu0 %v2711_v4  ;;  %v3860_v4 = vld [vmem:[#allocation2 + $0xd4] sm:$0xf0]  ;;  %v2986_v56 = vld [vmem:[#allocation2 + $0x288] sm:$0xf] }
  0x50   :  { %1077 = vmatpush.bf16.msra.mxu1 %v2839_v6  ;;  %v2890_v6 = vld [vmem:[#allocation2 + $0x1c8] sm:$0xf]  ;;  %v3920_v46 = vld [vmem:[#allocation2 + $0x2b4] sm:$0xf0] }
  0x51   :  { %1090 = vmatpush.bf16.msra.mxu2 %v2967_v16  ;;  %v3952_v49 = vld [vmem:[#allocation2 + $0x3b4] sm:$0xf0]  ;;  %v2810_v14 = vld [vmem:[#allocation2 + $0x128] sm:$0xf] }
  0x52   :  { %1103 = vmatpush.bf16.msra.mxu3 %v3095_v18  ;;  %v2891_v18 = vor.u32 %v3892_v7, %v2890_v6  ;;  %v2970_v6 = vld [vmem:[#allocation2 + $0x268] sm:$0xf]  ;;  %v3912_v7 = vld [vmem:[#allocation2 + $0x274] sm:$0xf0] }
  0x53   :  { %1065 = vmatpush.bf16.msra.mxu0 %v2695_v11  ;;  %v3840_v13 = vld [vmem:[#allocation2 + $0x34] sm:$0xf0] }
  0x54   :  { %1078 = vmatpush.bf16.msra.mxu1 %v2823_v12  ;;  %v2763_v12 = vor.u32 %v3860_v4, %v2762_v3 }
  0x55   :  { %1091 = vmatpush.bf16.msra.mxu2 %v2951_v28  ;;  %v3163_v28 = vor.u32 %v3960_v19, %v3162_v15  ;;  %v3872_v15 = vld [vmem:[#allocation2 + $0x134] sm:$0xf0] }
  0x56   :  { %1104 = vmatpush.bf16.msra.mxu3 %v3079_v30  ;;  %v3018_v30 = vld [vmem:[#allocation2 + $0x2c8] sm:$0xf]  ;;  %v3908_v19 = vld [vmem:[#allocation2 + $0x254] sm:$0xf0] }
  0x57   :  { %1066 = vmatpush.bf16.msra.mxu0 %v2679_v21  ;;  %v3856_v21 = vld [vmem:[#allocation2 + $0xb4] sm:$0xf0]  ;;  %v3019_v41 = vor.u32 %v3924_v31, %v3018_v30  ;;  %v2780_v31 = vld [vmem:[#allocation2 + $0xf8] sm:$0xf0] }
  0x58   :  { %1079 = vmatpush.bf16.msra.mxu1 %v2807_v24  ;;  %v3888_v24 = vld [vmem:[#allocation2 + $0x1b4] sm:$0xf0]  ;;  %v2747_v29 = vor.u32 %v3856_v21, %v2746_v20  ;;  %v3082_v20 = vld [vmem:[#allocation2 + $0x348] sm:$0xf] }
  0x59   :  { %1092 = vmatpush.bf16.msra.mxu2 %v2935_v39  ;;  %v3884_v39 = vld [vmem:[#allocation2 + $0x194] sm:$0xf0] }
  0x5a   :  { %1105 = vmatpush.bf16.msra.mxu3 %v3063_v42  ;;  %v2859_v47 = vor.u32 %v3884_v39, %v2858_v38 }
  0x5b   :  { %1067 = vmatpush.bf16.msra.mxu0 %v2663_v34  ;;  %v2875_v34 = vor.u32 %v3888_v24, %v2874_v23  ;;  %v3940_v23 = vld [vmem:[#allocation2 + $0x354] sm:$0xf0]  ;;  %v2666_v24 = vld [vmem:[#allocation2 + $0x8] sm:$0xf] }
  0x5c   :  { %1080 = vmatpush.bf16.msra.mxu1 %v2791_v36  ;;  %v2730_v36 = vld [vmem:[#allocation2 + $0x88] sm:$0xf]  ;;  %v3083_v35 = vor.u32 %v3940_v23, %v3082_v20  ;;  %v3132_v23 = vld [vmem:[#allocation2 + $0x3b8] sm:$0xf0] }
  0x5d   :  { %1093 = vmatpush.bf16.msra.mxu2 %v2919_v45  ;;  %v2731_v44 = vor.u32 %v3852_v37, %v2730_v36  ;;  %v3002_v45 = vld [vmem:[#allocation2 + $0x2a8] sm:$0xf]  ;;  %v3904_v37 = vld [vmem:[#allocation2 + $0x234] sm:$0xf0] }
  0x5e   :  { %1106 = vmatpush.bf16.msra.mxu3 %v3047_v48  ;;  %v3130_v48 = vld [vmem:[#allocation2 + $0x3a8] sm:$0xf] }
  0x5f   :  { %v3131_v55 = vor.u32 %v3952_v49, %v3130_v48  ;;  %v2938_v36 = vld [vmem:[#allocation2 + $0x228] sm:$0xf]  ;;  %v2892_v48 = vld [vmem:[#allocation2 + $0x1d8] sm:$0xf0] }
  0x9b   :  { %v189_v52 = vpop.f32.mrf.mxu0 }
  0x9c   :  { %v190_v53 = vadd.f32 %v189_v52, %v88_v50  ;;  %v202_v54 = vpop.f32.mrf.mxu1  ;;  %v2714_v50 = vld [vmem:[#allocation2 + $0x68] sm:$0xf] }
  0x9d   :  { %v203_v57 = vadd.f32 %v202_v54, %v89_v51  ;;  %v3848_v51 = vld [vmem:[#allocation2 + $0x74] sm:$0xf0]  ;;  %v2842_v52 = vld [vmem:[#allocation2 + $0x168] sm:$0xf]  ;;  %v3003_v54 = vor.u32 %v3920_v46, %v3002_v45  ;;  %v2939_v45 = vor.u32 %v3904_v37, %v2938_v36  ;;  %v2764_v46 = vld [vmem:[#allocation2 + $0xd8] sm:$0xf0] }
  0x9e   :  { %v232_v60 = vmax.f32 %v190_v53, 0.0  ;;  %v3880_v53 = vld [vmem:[#allocation2 + $0x174] sm:$0xf0]  ;;  %v2715_v58 = vor.u32 %v3848_v51, %v2714_v50  ;;  %v2922_v50 = vld [vmem:[#allocation2 + $0x208] sm:$0xf] }
  0x9f   :  { %v233_v61 = vmax.f32 %v203_v57, 0.0  ;;  %v3916_v57 = vld [vmem:[#allocation2 + $0x294] sm:$0xf0]  ;;  %v2843_v59 = vor.u32 %v3880_v53, %v2842_v52  ;;  %v3050_v52 = vld [vmem:[#allocation2 + $0x308] sm:$0xf] }
  0xa0   :  { %v4380_v0 = vpack.c.bf16 %v232_v60, %v232_v60  ;;  %v3114_v60 = vld [vmem:[#allocation2 + $0x388] sm:$0xf]  ;;  %v2987_v3 = vor.u32 %v3916_v57, %v2986_v56  ;;  %v3900_v51 = vld [vmem:[#allocation2 + $0x214] sm:$0xf0]  ;;  %v3946_v36 = vld [vmem:[#allocation2 + $0x38c] sm:$0xf] }
  0xa1   :  { %v4382_v5 = vpack.c.bf16 %v233_v61, %v233_v61  ;;  %v3948_v61 = vld [vmem:[#allocation2 + $0x394] sm:$0xf0]  ;;  %v3116_v37 = vld [vmem:[#allocation2 + $0x398] sm:$0xf0] }
  0xa2   :  { %1016 = vmatmul.bf16.vlgmr.msrb.gmra.mxu0 %v4380_v0  ;;  %v3115_v4 = vor.u32 %v3948_v61, %v3114_v60  ;;  %v3932_v53 = vld [vmem:[#allocation2 + $0x314] sm:$0xf0]  ;;  %v3854_v60 = vld [vmem:[#allocation2 + $0xac] sm:$0xf]  ;;  %v2923_v61 = vor.u32 %v3900_v51, %v2922_v50  ;;  %v2684_v51 = vld [vmem:[#allocation2 + $0x38] sm:$0xf0] }
  0xa3   :  { %v215_v8 = vpop.f32.mrf.mxu2  ;;  %1029 = vmatmul.bf16.vlgmr.msrb.gmra.mxu1 %v4382_v5  ;;  %1112 = vmatpush.bf16.msrb.mxu0 %v2779_v63  ;;  %v191_v11 = vpop.f32.mrf.mxu0  ;;  %v3844_v63 = vld [vmem:[#allocation2 + $0x54] sm:$0xf0]  ;;  %v3838_v50 = vld [vmem:[#allocation2 + $0x2c] sm:$0xf] }
  0xa4   :  { %v216_v9 = vadd.f32 %v215_v8, %v90_v62  ;;  %v228_v10 = vpop.f32.mrf.mxu3  ;;  %1125 = vmatpush.bf16.msrb.mxu1 %v2907_v2  ;;  %v204_v17 = vpop.f32.mrf.mxu1  ;;  %v2698_v62 = vld [vmem:[#allocation2 + $0x48] sm:$0xf]  ;;  %v3876_v2 = vld [vmem:[#allocation2 + $0x154] sm:$0xf0] }
  0xa5   :  { %v229_v16 = vadd.f32 %v228_v10, %v91_v1  ;;  %v2826_v1 = vld [vmem:[#allocation2 + $0x148] sm:$0xf]  ;;  %v2699_v8 = vor.u32 %v3844_v63, %v2698_v62  ;;  %v3944_v11 = vld [vmem:[#allocation2 + $0x374] sm:$0xf0]  ;;  %v2748_v62 = vld [vmem:[#allocation2 + $0xb8] sm:$0xf0] }
  0xa6   :  { %v234_v22 = vmax.f32 %v216_v9, 0.0  ;;  %v2827_v9 = vor.u32 %v3876_v2, %v2826_v1  ;;  %v3098_v10 = vld [vmem:[#allocation2 + $0x368] sm:$0xf]  ;;  %v3886_v63 = vld [vmem:[#allocation2 + $0x1ac] sm:$0xf]  ;;  %v3051_v2 = vor.u32 %v3932_v53, %v3050_v52 }
  0xa7   :  { %v235_v25 = vmax.f32 %v229_v16, 0.0  ;;  %1113 = vmatpush.bf16.msrb.mxu0 %v2763_v12  ;;  %v2682_v12 = vld [vmem:[#allocation2 + $0x28] sm:$0xf]  ;;  %v2971_v16 = vor.u32 %v3912_v7, %v2970_v6  ;;  %v3099_v17 = vor.u32 %v3944_v11, %v3098_v10  ;;  %v2876_v1 = vld [vmem:[#allocation2 + $0x1b8] sm:$0xf0] }
  0xa8   :  { %v4386_v27 = vpack.c.bf16 %v234_v22, %v234_v22  ;;  %1126 = vmatpush.bf16.msrb.mxu1 %v2891_v18  ;;  %v2954_v18 = vld [vmem:[#allocation2 + $0x248] sm:$0xf]  ;;  %v2683_v21 = vor.u32 %v3840_v13, %v2682_v12  ;;  %v2811_v22 = vor.u32 %v3872_v15, %v2810_v14  ;;  %v3922_v6 = vld [vmem:[#allocation2 + $0x2cc] sm:$0xf]  ;;  %v3020_v7 = vld [vmem:[#allocation2 + $0x2d8] sm:$0xf0] }
  0xa9   :  { %v4388_v33 = vpack.c.bf16 %v235_v25, %v235_v25  ;;  %v3836_v25 = vld [vmem:[#allocation2 + $0x14] sm:$0xf0]  ;;  %v2955_v30 = vor.u32 %v3908_v19, %v2954_v18  ;;  %v3954_v10 = vld [vmem:[#allocation2 + $0x3cc] sm:$0xf]  ;;  %v3148_v11 = vld [vmem:[#allocation2 + $0x3d8] sm:$0xf0] }
  0xaa   :  { %1042 = vmatmul.bf16.vlgmr.msrb.gmra.mxu2 %v4386_v27  ;;  %v2667_v38 = vor.u32 %v3836_v25, %v2666_v24  ;;  %v3850_v12 = vld [vmem:[#allocation2 + $0x8c] sm:$0xf]  ;;  %v2732_v13 = vld [vmem:[#allocation2 + $0x98] sm:$0xf0] }
  0xab   :  { %1055 = vmatmul.bf16.vlgmr.msrb.gmra.mxu3 %v4388_v33  ;;  %1138 = vmatpush.bf16.msrb.mxu2 %v3035_v26  ;;  %v217_v40 = vpop.f32.mrf.mxu2  ;;  %v2794_v26 = vld [vmem:[#allocation2 + $0x108] sm:$0xf]  ;;  %v3882_v14 = vld [vmem:[#allocation2 + $0x18c] sm:$0xf]  ;;  %v2860_v15 = vld [vmem:[#allocation2 + $0x198] sm:$0xf0]  ;;  %v2735_v20 = vor.u32 %v3850_v12, %v2732_v13 }
  0xac   :  { %1151 = vmatpush.bf16.msrb.mxu3 %v3163_v28  ;;  %v230_v42 = vpop.f32.mrf.mxu3  ;;  %1114 = vmatpush.bf16.msrb.mxu0 %v2747_v29  ;;  %v3868_v28 = vld [vmem:[#allocation2 + $0x114] sm:$0xf0]  ;;  %v3862_v29 = vld [vmem:[#allocation2 + $0xec] sm:$0xf]  ;;  %v3066_v40 = vld [vmem:[#allocation2 + $0x328] sm:$0xf] }
  0xad   :  { %1127 = vmatpush.bf16.msrb.mxu1 %v2875_v34  ;;  %v2908_v34 = vld [vmem:[#allocation2 + $0x1f8] sm:$0xf0]  ;;  %v2795_v39 = vor.u32 %v3868_v28, %v2794_v26  ;;  %v2783_v42 = vor.u32 %v3862_v29, %v2780_v31  ;;  %v3918_v18 = vld [vmem:[#allocation2 + $0x2ac] sm:$0xf] }
  0xae   :  { %v3004_v19 = vld [vmem:[#allocation2 + $0x2b8] sm:$0xf0]  ;;  %v3846_v24 = vld [vmem:[#allocation2 + $0x6c] sm:$0xf] }
  0xaf   :  { %1139 = vmatpush.bf16.msrb.mxu2 %v3019_v41  ;;  %v3936_v41 = vld [vmem:[#allocation2 + $0x334] sm:$0xf0]  ;;  %v2716_v25 = vld [vmem:[#allocation2 + $0x78] sm:$0xf0]  ;;  %v3878_v26 = vld [vmem:[#allocation2 + $0x16c] sm:$0xf]  ;;  %v3007_v29 = vor.u32 %v3918_v18, %v3004_v19 }
  0xb0   :  { %1152 = vmatpush.bf16.msrb.mxu3 %v3147_v43  ;;  %1115 = vmatpush.bf16.msrb.mxu0 %v2731_v44  ;;  %v2911_v43 = vor.u32 %v3894_v32, %v2908_v34  ;;  %v3858_v44 = vld [vmem:[#allocation2 + $0xcc] sm:$0xf]  ;;  %v3067_v49 = vor.u32 %v3936_v41, %v3066_v40  ;;  %v2844_v28 = vld [vmem:[#allocation2 + $0x178] sm:$0xf0]  ;;  %v2719_v34 = vor.u32 %v3846_v24, %v2716_v25  ;;  %v3266_v18 = vld [vmem:[#allocation5 + $0xc0] sm:$0xf] }
  0xb1   :  { %1128 = vmatpush.bf16.msrb.mxu1 %v2859_v47  ;;  %v3890_v47 = vld [vmem:[#allocation2 + $0x1cc] sm:$0xf]  ;;  %v2767_v56 = vor.u32 %v3858_v44, %v2764_v46  ;;  %v2988_v32 = vld [vmem:[#allocation2 + $0x298] sm:$0xf0] }
  0xb2   :  { %1068 = vmatmul.bf16.vlgmr.msra.gmra.mxu0 %v4380_v0  ;;  %v2895_v57 = vor.u32 %v3890_v47, %v2892_v48  ;;  %v3914_v31 = vld [vmem:[#allocation2 + $0x28c] sm:$0xf]  ;;  %v2828_v41 = vld [vmem:[#allocation2 + $0x158] sm:$0xf0] }
  0xb3   :  { %1140 = vmatpush.bf16.msrb.mxu2 %v3003_v54  ;;  %1081 = vmatmul.bf16.vlgmr.msra.gmra.mxu1 %v4382_v5  ;;  %v3926_v54 = vld [vmem:[#allocation2 + $0x2ec] sm:$0xf]  ;;  %v2812_v53 = vld [vmem:[#allocation2 + $0x138] sm:$0xf0] }
  0xb4   :  { %1153 = vmatpush.bf16.msrb.mxu3 %v3131_v55  ;;  %1116 = vmatpush.bf16.msrb.mxu0 %v2715_v58  ;;  %v3036_v55 = vld [vmem:[#allocation2 + $0x2f8] sm:$0xf0]  ;;  %v3958_v58 = vld [vmem:[#allocation2 + $0x3ec] sm:$0xf] }
  0xb5   :  { %1129 = vmatpush.bf16.msrb.mxu1 %v2843_v59  ;;  %v3164_v59 = vld [vmem:[#allocation2 + $0x3f8] sm:$0xf0]  ;;  %v3874_v40 = vld [vmem:[#allocation2 + $0x14c] sm:$0xf] }
  0xb6   :  { %v3910_v44 = vld [vmem:[#allocation2 + $0x26c] sm:$0xf]  ;;  %v2831_v47 = vor.u32 %v3874_v40, %v2828_v41  ;;  %v2924_v25 = vld [vmem:[#allocation2 + $0x218] sm:$0xf0]  ;;  %v3378_v41 = vld [vmem:[#allocation5 + $0x1a0] sm:$0xf] }
  0xb7   :  { %1141 = vmatpush.bf16.msrb.mxu2 %v2987_v3  ;;  %v3039_v3 = vor.u32 %v3926_v54, %v3036_v55  ;;  %v3942_v48 = vld [vmem:[#allocation2 + $0x36c] sm:$0xf] }
  0xb8   :  { %1154 = vmatpush.bf16.msrb.mxu3 %v3115_v4  ;;  %1117 = vmatpush.bf16.msrb.mxu0 %v2699_v8  ;;  %v3167_v4 = vor.u32 %v3958_v58, %v3164_v59  ;;  %v2751_v8 = vor.u32 %v3854_v60, %v2748_v62  ;;  %v3870_v52 = vld [vmem:[#allocation2 + $0x12c] sm:$0xf]  ;;  %v2687_v59 = vor.u32 %v3838_v50, %v2684_v51  ;;  %v3234_v50 = vld [vmem:[#allocation5 + $0x80] sm:$0xf]  ;;  %v3979_v51 = vld [vmem:[#allocation5 + $0x8c] sm:$0xf0] }
  0xb9   :  { %1130 = vmatpush.bf16.msrb.mxu1 %v2827_v9  ;;  %v2879_v9 = vor.u32 %v3886_v63, %v2876_v1  ;;  %v3938_v58 = vld [vmem:[#allocation2 + $0x34c] sm:$0xf]  ;;  %v2815_v60 = vor.u32 %v3870_v52, %v2812_v53  ;;  %v2668_v63 = vld [vmem:[#allocation2 + $0x18] sm:$0xf0]  ;;  %v3362_v53 = vld [vmem:[#allocation5 + $0x180] sm:$0xf] }
  0xba   :  { %1094 = vmatmul.bf16.vlgmr.msra.gmra.mxu2 %v4386_v27  ;;  %v3834_v62 = vld [vmem:[#allocation2 + $0xc] sm:$0xf] }
  0xbb   :  { %1107 = vmatmul.bf16.vlgmr.msra.gmra.mxu3 %v4388_v33  ;;  %1142 = vmatpush.bf16.msrb.mxu2 %v2971_v16  ;;  %v3023_v16 = vor.u32 %v3922_v6, %v3020_v7  ;;  %v3866_v1 = vld [vmem:[#allocation2 + $0x10c] sm:$0xf]  ;;  %v3991_v6 = vld [vmem:[#allocation5 + $0xec] sm:$0xf0]  ;;  %v3410_v7 = vld [vmem:[#allocation5 + $0x1e0] sm:$0xf]  ;;  %v2671_v12 = vor.u32 %v3834_v62, %v2668_v63 }
  0xbc   :  { %1155 = vmatpush.bf16.msrb.mxu3 %v3099_v17  ;;  %1118 = vmatpush.bf16.msrb.mxu0 %v2683_v21  ;;  %v3151_v17 = vor.u32 %v3954_v10, %v3148_v11  ;;  %v2863_v21 = vor.u32 %v3882_v14, %v2860_v15  ;;  %v3902_v10 = vld [vmem:[#allocation2 + $0x22c] sm:$0xf]  ;;  %v2940_v11 = vld [vmem:[#allocation2 + $0x238] sm:$0xf0]  ;;  %v3218_v62 = vld [vmem:[#allocation5 + $0x60] sm:$0xf] }
  0xbd   :  { %1131 = vmatpush.bf16.msrb.mxu1 %v2811_v22  ;;  %v3950_v22 = vld [vmem:[#allocation2 + $0x3ac] sm:$0xf]  ;;  %v3068_v15 = vld [vmem:[#allocation2 + $0x338] sm:$0xf0]  ;;  %v2943_v19 = vor.u32 %v3902_v10, %v2940_v11  ;;  %v3975_v63 = vld [vmem:[#allocation5 + $0x6c] sm:$0xf0] }
  0xbe   :  { %v3934_v14 = vld [vmem:[#allocation2 + $0x32c] sm:$0xf]  ;;  %v4075_v10 = vld [vmem:[#allocation5 + $0x38c] sm:$0xf0] }
  0xbf   :  { %1143 = vmatpush.bf16.msrb.mxu2 %v2955_v30  ;;  %v3135_v30 = vor.u32 %v3950_v22, %v3132_v23  ;;  %v4019_v22 = vld [vmem:[#allocation5 + $0x1cc] sm:$0xf0]  ;;  %v3071_v23 = vor.u32 %v3934_v14, %v3068_v15  ;;  %v3898_v24 = vld [vmem:[#allocation2 + $0x20c] sm:$0xf]  ;;  %v3330_v15 = vld [vmem:[#allocation5 + $0x140] sm:$0xf] }
  0xc0   :  { %1156 = vmatpush.bf16.msrb.mxu3 %v3083_v35  ;;  %1119 = vmatpush.bf16.msrb.mxu0 %v2667_v38  ;;  %v2847_v35 = vor.u32 %v3878_v26, %v2844_v28  ;;  %v3842_v38 = vld [vmem:[#allocation2 + $0x4c] sm:$0xf]  ;;  %v3052_v28 = vld [vmem:[#allocation2 + $0x318] sm:$0xf0] }
  0xc1   :  { %1132 = vmatpush.bf16.msrb.mxu1 %v2795_v39  ;;  %v2700_v39 = vld [vmem:[#allocation2 + $0x58] sm:$0xf0]  ;;  %v3930_v26 = vld [vmem:[#allocation2 + $0x30c] sm:$0xf] }
  0xc2   :  { %v2703_v46 = vor.u32 %v3842_v38, %v2700_v39  ;;  %v3983_v38 = vld [vmem:[#allocation5 + $0xac] sm:$0xf0]  ;;  %v3055_v39 = vor.u32 %v3930_v26, %v3052_v28  ;;  %v3314_v28 = vld [vmem:[#allocation5 + $0x120] sm:$0xf] }
  0xc3   :  { %1144 = vmatpush.bf16.msrb.mxu2 %v2939_v45  ;;  %1120 = vmatmul.bf16.vlgmr.msrb.gmra.mxu0 %v4380_v0  ;;  %v2972_v45 = vld [vmem:[#allocation2 + $0x278] sm:$0xf0] }
  0xc4   :  { %1164 = vmatpush.bf16.msra.mxu0 %v2783_v42  ;;  %1157 = vmatpush.bf16.msrb.mxu3 %v3067_v49  ;;  %v2991_v42 = vor.u32 %v3914_v31, %v2988_v32  ;;  %v3100_v49 = vld [vmem:[#allocation2 + $0x378] sm:$0xf0]  ;;  %v2975_v54 = vor.u32 %v3910_v44, %v2972_v45  ;;  %v3522_v44 = vld [vmem:[#allocation5 + $0x2c0] sm:$0xf]  ;;  %v4051_v45 = vld [vmem:[#allocation5 + $0x2cc] sm:$0xf0] }
  0xc5   :  { %1177 = vmatpush.bf16.msra.mxu1 %v2911_v43  ;;  %v3119_v43 = vor.u32 %v3946_v36, %v3116_v37  ;;  %v3103_v55 = vor.u32 %v3942_v48, %v3100_v49  ;;  %v2927_v36 = vor.u32 %v3898_v24, %v2924_v25  ;;  %v3250_v37 = vld [vmem:[#allocation5 + $0xa0] sm:$0xf]  ;;  %v4083_v48 = vld [vmem:[#allocation5 + $0x3cc] sm:$0xf0]  ;;  %v3523_v52 = vor.u32 %v4051_v45, %v3522_v44  ;;  %v3284_v44 = vld [vmem:[#allocation5 + $0xf0] sm:$0xf0] }
  0xc6   :  { %1133 = vmatmul.bf16.vlgmr.msrb.gmra.mxu1 %v4382_v5  ;;  %v3186_v24 = vld [vmem:[#allocation5 + $0x20] sm:$0xf]  ;;  %v3967_v25 = vld [vmem:[#allocation5 + $0x2c] sm:$0xf0]  ;;  %v4021_v45 = vld [vmem:[#allocation5 + $0x1e4] sm:$0xf] }
  0xc7   :  { %1145 = vmatpush.bf16.msrb.mxu2 %v2923_v61  ;;  %v3084_v61 = vld [vmem:[#allocation2 + $0x358] sm:$0xf0] }
  0xc8   :  { %1165 = vmatpush.bf16.msra.mxu0 %v2767_v56  ;;  %1158 = vmatpush.bf16.msrb.mxu3 %v3051_v2  ;;  %v3906_v56 = vld [vmem:[#allocation2 + $0x24c] sm:$0xf]  ;;  %v2796_v2 = vld [vmem:[#allocation2 + $0x118] sm:$0xf0] }
  0xc9   :  { %1178 = vmatpush.bf16.msra.mxu1 %v2895_v57  ;;  %v2956_v57 = vld [vmem:[#allocation2 + $0x258] sm:$0xf0]  ;;  %v2799_v13 = vor.u32 %v3866_v1, %v2796_v2  ;;  %v3346_v2 = vld [vmem:[#allocation5 + $0x160] sm:$0xf] }
  0xca   :  { %1146 = vmatmul.bf16.vlgmr.msrb.gmra.mxu2 %v4386_v27 }
  0xcb   :  { %1190 = vmatpush.bf16.msra.mxu2 %v3039_v3  ;;  %1159 = vmatmul.bf16.vlgmr.msrb.gmra.mxu3 %v4388_v33  ;;  %v3282_v3 = vld [vmem:[#allocation5 + $0xe0] sm:$0xf] }
  0xcc   :  { %1203 = vmatpush.bf16.msra.mxu3 %v3167_v4  ;;  %1166 = vmatpush.bf16.msra.mxu0 %v2751_v8  ;;  %v2959_v4 = vor.u32 %v3906_v56, %v2956_v57  ;;  %v4023_v8 = vld [vmem:[#allocation5 + $0x1ec] sm:$0xf0]  ;;  %v3506_v56 = vld [vmem:[#allocation5 + $0x2a0] sm:$0xf] }
  0xcd   :  { %1179 = vmatpush.bf16.msra.mxu1 %v2879_v9  ;;  %v3087_v9 = vor.u32 %v3938_v58, %v3084_v61  ;;  %v4047_v57 = vld [vmem:[#allocation5 + $0x2ac] sm:$0xf0]  ;;  %v3235_v58 = vor.u32 %v3979_v51, %v3234_v50  ;;  %v3570_v51 = vld [vmem:[#allocation5 + $0x320] sm:$0xf] }
  0xce   :  { %v3507_v1 = vor.u32 %v4047_v57, %v3506_v56 }
  0xcf   :  { %1191 = vmatpush.bf16.msra.mxu2 %v3023_v16  ;;  %v3283_v16 = vor.u32 %v3991_v6, %v3282_v3  ;;  %v4007_v3 = vld [vmem:[#allocation5 + $0x16c] sm:$0xf0]  ;;  %v3490_v6 = vld [vmem:[#allocation5 + $0x280] sm:$0xf] }
  0xd0   :  { %1204 = vmatpush.bf16.msra.mxu3 %v3151_v17  ;;  %1167 = vmatpush.bf16.msra.mxu0 %v2735_v20  ;;  %v3411_v17 = vor.u32 %v4023_v8, %v3410_v7  ;;  %v3987_v20 = vld [vmem:[#allocation5 + $0xcc] sm:$0xf0]  ;;  %v3219_v8 = vor.u32 %v3975_v63, %v3218_v62  ;;  %v3347_v11 = vor.u32 %v4007_v3, %v3346_v2  ;;  %v3426_v62 = vld [vmem:[#allocation5 + $0x200] sm:$0xf]  ;;  %v4053_v3 = vld [vmem:[#allocation5 + $0x2e4] sm:$0xf] }
  0xd1   :  { %1180 = vmatpush.bf16.msra.mxu1 %v2863_v21  ;;  %v3394_v21 = vld [vmem:[#allocation5 + $0x1c0] sm:$0xf]  ;;  %v3267_v31 = vor.u32 %v3987_v20, %v3266_v18  ;;  %v4043_v7 = vld [vmem:[#allocation5 + $0x28c] sm:$0xf0] }
  0xd2   :  { %v3395_v32 = vor.u32 %v4019_v22, %v3394_v21  ;;  %v3491_v14 = vor.u32 %v4043_v7, %v3490_v6  ;;  %v3474_v18 = vld [vmem:[#allocation5 + $0x260] sm:$0xf]  ;;  %v4071_v22 = vld [vmem:[#allocation5 + $0x36c] sm:$0xf0]  ;;  %v4085_v7 = vld [vmem:[#allocation5 + $0x3e4] sm:$0xf] }
  0xd3   :  { %1192 = vmatpush.bf16.msra.mxu2 %v3007_v29  ;;  %v3538_v29 = vld [vmem:[#allocation5 + $0x2e0] sm:$0xf]  ;;  %v4027_v63 = vld [vmem:[#allocation5 + $0x20c] sm:$0xf0] }
  0xd4   :  { %1205 = vmatpush.bf16.msra.mxu3 %v3135_v30  ;;  %1168 = vmatpush.bf16.msra.mxu0 %v2719_v34  ;;  %v4055_v30 = vld [vmem:[#allocation5 + $0x2ec] sm:$0xf0]  ;;  %v3666_v34 = vld [vmem:[#allocation5 + $0x3e0] sm:$0xf] }
  0xd5   :  { %1181 = vmatpush.bf16.msra.mxu1 %v2847_v35  ;;  %v4087_v35 = vld [vmem:[#allocation5 + $0x3ec] sm:$0xf0]  ;;  %v3539_v40 = vor.u32 %v4055_v30, %v3538_v29  ;;  %v3602_v21 = vld [vmem:[#allocation5 + $0x360] sm:$0xf] }
  0xd6   :  { %v3999_v29 = vld [vmem:[#allocation5 + $0x12c] sm:$0xf0]  ;;  %v3603_v30 = vor.u32 %v4071_v22, %v3602_v21  ;;  %v4081_v21 = vld [vmem:[#allocation5 + $0x3c4] sm:$0xf]  ;;  %v3652_v22 = vld [vmem:[#allocation5 + $0x3d0] sm:$0xf0] }
  0xd7   :  { %1193 = vmatpush.bf16.msra.mxu2 %v2991_v42  ;;  %v4015_v42 = vld [vmem:[#allocation5 + $0x1ac] sm:$0xf0] }
  0xd8   :  { %1206 = vmatpush.bf16.msra.mxu3 %v3119_v43  ;;  %1169 = vmatpush.bf16.msra.mxu0 %v2703_v46  ;;  %v3667_v43 = vor.u32 %v4087_v35, %v3666_v34  ;;  %v3251_v46 = vor.u32 %v3983_v38, %v3250_v37  ;;  %v3379_v49 = vor.u32 %v4015_v42, %v3378_v41  ;;  %v3586_v35 = vld [vmem:[#allocation5 + $0x340] sm:$0xf]  ;;  %v3995_v41 = vld [vmem:[#allocation5 + $0x10c] sm:$0xf0] }
  0xd9   :  { %1182 = vmatpush.bf16.msra.mxu1 %v2831_v47  ;;  %v3650_v47 = vld [vmem:[#allocation5 + $0x3c0] sm:$0xf]  ;;  %v3187_v34 = vor.u32 %v3967_v25, %v3186_v24  ;;  %v3315_v38 = vor.u32 %v3999_v29, %v3314_v28  ;;  %v4059_v2 = vld [vmem:[#allocation5 + $0x30c] sm:$0xf0]  ;;  %v3977_v24 = vld [vmem:[#allocation5 + $0x84] sm:$0xf] }
  0xda   :  { %v3170_v37 = vld [vmem:[#allocation5] sm:$0xf]  ;;  %v3236_v25 = vld [vmem:[#allocation5 + $0x90] sm:$0xf0]  ;;  %v4009_v28 = vld [vmem:[#allocation5 + $0x184] sm:$0xf] }
  0xdb   :  { %1194 = vmatpush.bf16.msra.mxu2 %v2975_v54  ;;  %v4011_v54 = vld [vmem:[#allocation5 + $0x18c] sm:$0xf0]  ;;  %v3364_v29 = vld [vmem:[#allocation5 + $0x190] sm:$0xf0] }
  0xdc   :  { %1207 = vmatpush.bf16.msra.mxu3 %v3103_v55  ;;  %1170 = vmatpush.bf16.msra.mxu0 %v2687_v59  ;;  %v3651_v55 = vor.u32 %v4083_v48, %v3650_v47  ;;  %v3634_v59 = vld [vmem:[#allocation5 + $0x3a0] sm:$0xf]  ;;  %v3363_v61 = vor.u32 %v4011_v54, %v3362_v53  ;;  %v3412_v47 = vld [vmem:[#allocation5 + $0x1f0] sm:$0xf0] }
  0xdd   :  { %1183 = vmatpush.bf16.msra.mxu1 %v2815_v60  ;;  %v4079_v60 = vld [vmem:[#allocation5 + $0x3ac] sm:$0xf0]  ;;  %v3442_v48 = vld [vmem:[#allocation5 + $0x220] sm:$0xf]  ;;  %v3415_v56 = vor.u32 %v4021_v45, %v3412_v47  ;;  %v3492_v45 = vld [vmem:[#allocation5 + $0x290] sm:$0xf0] }
  0xde   :  { %v4073_v47 = vld [vmem:[#allocation5 + $0x384] sm:$0xf] }
  0xdf   :  { %1195 = vmatpush.bf16.msra.mxu2 %v2959_v4  ;;  %v3635_v4 = vor.u32 %v4079_v60, %v3634_v59  ;;  %v4017_v59 = vld [vmem:[#allocation5 + $0x1c4] sm:$0xf]  ;;  %v3396_v60 = vld [vmem:[#allocation5 + $0x1d0] sm:$0xf0] }
  0xe0   :  { %1208 = vmatpush.bf16.msra.mxu3 %v3087_v9  ;;  %1171 = vmatpush.bf16.msra.mxu0 %v2671_v12  ;;  %v3618_v9 = vld [vmem:[#allocation5 + $0x380] sm:$0xf] }
  0xe1   :  { %1184 = vmatpush.bf16.msra.mxu1 %v2799_v13  ;;  %v3202_v12 = vld [vmem:[#allocation5 + $0x40] sm:$0xf]  ;;  %v3971_v13 = vld [vmem:[#allocation5 + $0x4c] sm:$0xf0] }
  0xe2   :  { %v3203_v20 = vor.u32 %v3971_v13, %v3202_v12  ;;  %v3252_v12 = vld [vmem:[#allocation5 + $0xb0] sm:$0xf0] }
  0xe3   :  { %1196 = vmatpush.bf16.msra.mxu2 %v2943_v19  ;;  %1172 = vmatmul.bf16.vlgmr.msra.gmra.mxu0 %v4380_v0  ;;  %v4039_v19 = vld [vmem:[#allocation5 + $0x26c] sm:$0xf0] }
  0xe4   :  { %1984 = vmatpush.bf16.msrb.mxu0 %v3283_v16  ;;  %1209 = vmatpush.bf16.msra.mxu3 %v3071_v23  ;;  %v4003_v16 = vld [vmem:[#allocation5 + $0x14c] sm:$0xf0]  ;;  %v3475_v26 = vor.u32 %v4039_v19, %v3474_v18  ;;  %v4049_v18 = vld [vmem:[#allocation5 + $0x2c4] sm:$0xf]  ;;  %v3524_v19 = vld [vmem:[#allocation5 + $0x2d0] sm:$0xf0] }
  0xe5   :  { %1997 = vmatpush.bf16.msrb.mxu1 %v3411_v17  ;;  %v3619_v17 = vor.u32 %v4075_v10, %v3618_v9  ;;  %v3331_v23 = vor.u32 %v4003_v16, %v3330_v15  ;;  %v3399_v9 = vor.u32 %v4017_v59, %v3396_v60  ;;  %v3427_v10 = vor.u32 %v4027_v63, %v3426_v62  ;;  %v4013_v15 = vld [vmem:[#allocation5 + $0x1a4] sm:$0xf]  ;;  %v3380_v16 = vld [vmem:[#allocation5 + $0x1b0] sm:$0xf0] }
  0xe6   :  { %1185 = vmatmul.bf16.vlgmr.msra.gmra.mxu1 %v4382_v5  ;;  %v4069_v59 = vld [vmem:[#allocation5 + $0x364] sm:$0xf]  ;;  %v3604_v60 = vld [vmem:[#allocation5 + $0x370] sm:$0xf0] }
  0xe7   :  { %1197 = vmatpush.bf16.msra.mxu2 %v2927_v36  ;;  %v4067_v36 = vld [vmem:[#allocation5 + $0x34c] sm:$0xf0]  ;;  %v3965_v62 = vld [vmem:[#allocation5 + $0x24] sm:$0xf]  ;;  %v3188_v63 = vld [vmem:[#allocation5 + $0x30] sm:$0xf0] }
  0xe8   :  { %1985 = vmatpush.bf16.msrb.mxu0 %v3267_v31  ;;  %1210 = vmatpush.bf16.msra.mxu3 %v3055_v39  ;;  %v3458_v31 = vld [vmem:[#allocation5 + $0x240] sm:$0xf]  ;;  %v3963_v39 = vld [vmem:[#allocation5 + $0xc] sm:$0xf0] }
  0xe9   :  { %1998 = vmatpush.bf16.msrb.mxu1 %v3395_v32  ;;  %v4035_v32 = vld [vmem:[#allocation5 + $0x24c] sm:$0xf0]  ;;  %v3171_v50 = vor.u32 %v3963_v39, %v3170_v37  ;;  %v3367_v37 = vor.u32 %v4009_v28, %v3364_v29  ;;  %v3220_v39 = vld [vmem:[#allocation5 + $0x70] sm:$0xf0] }
  0xea   :  { %1198 = vmatmul.bf16.vlgmr.msra.gmra.mxu2 %v4386_v27  ;;  %v3459_v42 = vor.u32 %v4035_v32, %v3458_v31  ;;  %v4045_v31 = vld [vmem:[#allocation5 + $0x2a4] sm:$0xf]  ;;  %v3508_v32 = vld [vmem:[#allocation5 + $0x2b0] sm:$0xf0] }
  0xeb   :  { %2010 = vmatpush.bf16.msrb.mxu2 %v3539_v40  ;;  %1211 = vmatmul.bf16.vlgmr.msra.gmra.mxu3 %v4388_v33  ;;  %v3298_v40 = vld [vmem:[#allocation5 + $0x100] sm:$0xf] }
  0xec   :  { %2023 = vmatpush.bf16.msrb.mxu3 %v3667_v43  ;;  %1986 = vmatpush.bf16.msrb.mxu0 %v3251_v46  ;;  %v3989_v43 = vld [vmem:[#allocation5 + $0xe4] sm:$0xf]  ;;  %v3587_v46 = vor.u32 %v4067_v36, %v3586_v35  ;;  %v3299_v53 = vor.u32 %v3995_v41, %v3298_v40  ;;  %v3636_v36 = vld [vmem:[#allocation5 + $0x3b0] sm:$0xf0]  ;;  %v3511_v40 = vor.u32 %v4045_v31, %v3508_v32 }
  0xed   :  { %1999 = vmatpush.bf16.msrb.mxu1 %v3379_v49  ;;  %v4031_v49 = vld [vmem:[#allocation5 + $0x22c] sm:$0xf0]  ;;  %v3287_v54 = vor.u32 %v3989_v43, %v3284_v44  ;;  %v4077_v35 = vld [vmem:[#allocation5 + $0x3a4] sm:$0xf] }
  0xee   :  { %v3443_v57 = vor.u32 %v4031_v49, %v3442_v48  ;;  %v4005_v41 = vld [vmem:[#allocation5 + $0x164] sm:$0xf]  ;;  %v3639_v43 = vor.u32 %v4077_v35, %v3636_v36  ;;  %v3620_v48 = vld [vmem:[#allocation5 + $0x390] sm:$0xf0]  ;;  %v3402_v35 = vld [vmem:[#allocation5 + $0x1c8] sm:$0xf] }
  0xef   :  { %2011 = vmatpush.bf16.msrb.mxu2 %v3523_v52  ;;  %v4063_v52 = vld [vmem:[#allocation5 + $0x32c] sm:$0xf0]  ;;  %v4041_v44 = vld [vmem:[#allocation5 + $0x284] sm:$0xf]  ;;  %v4020_v36 = vld [vmem:[#allocation5 + $0x1d4] sm:$0xf0] }
  0xf0   :  { %2024 = vmatpush.bf16.msrb.mxu3 %v3651_v55  ;;  %1987 = vmatpush.bf16.msrb.mxu0 %v3235_v58  ;;  %v3985_v55 = vld [vmem:[#allocation5 + $0xc4] sm:$0xf]  ;;  %v3268_v58 = vld [vmem:[#allocation5 + $0xd0] sm:$0xf0] }
  0xf1   :  { %2000 = vmatpush.bf16.msrb.mxu1 %v3363_v61  ;;  %v3571_v61 = vor.u32 %v4063_v52, %v3570_v51  ;;  %v3271_v6 = vor.u32 %v3985_v55, %v3268_v58  ;;  %v3204_v51 = vld [vmem:[#allocation5 + $0x50] sm:$0xf0]  ;;  %v3495_v52 = vor.u32 %v4041_v44, %v3492_v45  ;;  %v3623_v55 = vor.u32 %v4073_v47, %v3620_v48  ;;  %v3674_v45 = vld [vmem:[#allocation5 + $0x3e8] sm:$0xf] }
  0xf2   :  { %v3403_v47 = vor.u32 %v4020_v36, %v3402_v35  ;;  %v3482_v36 = vld [vmem:[#allocation5 + $0x268] sm:$0xf] }
  0xf3   :  { %2012 = vmatpush.bf16.msrb.mxu2 %v3507_v1  ;;  %v3554_v1 = vld [vmem:[#allocation5 + $0x300] sm:$0xf] }
  0xf4   :  { %2025 = vmatpush.bf16.msrb.mxu3 %v3635_v4  ;;  %1988 = vmatpush.bf16.msrb.mxu0 %v3219_v8  ;;  %v3540_v4 = vld [vmem:[#allocation5 + $0x2f0] sm:$0xf0]  ;;  %v3555_v13 = vor.u32 %v4059_v2, %v3554_v1  ;;  %v3997_v2 = vld [vmem:[#allocation5 + $0x124] sm:$0xf] }
  0xf5   :  { %2001 = vmatpush.bf16.msrb.mxu1 %v3347_v11  ;;  %v3668_v8 = vld [vmem:[#allocation5 + $0x3f0] sm:$0xf0]  ;;  %v3981_v11 = vld [vmem:[#allocation5 + $0xa4] sm:$0xf] }
  0xf7   :  { %2013 = vmatpush.bf16.msrb.mxu2 %v3491_v14  ;;  %v3543_v14 = vor.u32 %v4053_v3, %v3540_v4  ;;  %v3316_v3 = vld [vmem:[#allocation5 + $0x130] sm:$0xf0]  ;;  %v3607_v4 = vor.u32 %v4069_v59, %v3604_v60  ;;  %v3658_v59 = vld [vmem:[#allocation5 + $0x3c8] sm:$0xf]  ;;  %v4084_v60 = vld [vmem:[#allocation5 + $0x3d4] sm:$0xf0] }
  0xf8   :  { %2026 = vmatpush.bf16.msrb.mxu3 %v3619_v17  ;;  %1989 = vmatpush.bf16.msrb.mxu0 %v3203_v20  ;;  %v3671_v17 = vor.u32 %v4085_v7, %v3668_v8  ;;  %v3255_v20 = vor.u32 %v3981_v11, %v3252_v12  ;;  %v3460_v7 = vld [vmem:[#allocation5 + $0x250] sm:$0xf0]  ;;  %v3191_v8 = vor.u32 %v3965_v62, %v3188_v63  ;;  %v3961_v11 = vld [vmem:[#allocation5 + $0x4] sm:$0xf]  ;;  %v3242_v62 = vld [vmem:[#allocation5 + $0x88] sm:$0xf] }
  0xf9   :  { %2002 = vmatpush.bf16.msrb.mxu1 %v3331_v23  ;;  %v3383_v23 = vor.u32 %v4013_v15, %v3380_v16  ;;  %v3319_v12 = vor.u32 %v3997_v2, %v3316_v3  ;;  %v3300_v15 = vld [vmem:[#allocation5 + $0x110] sm:$0xf0]  ;;  %v3980_v63 = vld [vmem:[#allocation5 + $0x94] sm:$0xf0]  ;;  %v3370_v2 = vld [vmem:[#allocation5 + $0x188] sm:$0xf] }
  0xfa   :  { %v4012_v3 = vld [vmem:[#allocation5 + $0x194] sm:$0xf0] }
  0xfb   :  { %2014 = vmatpush.bf16.msrb.mxu2 %v3475_v26  ;;  %v3527_v26 = vor.u32 %v4049_v18, %v3524_v19  ;;  %v3992_v18 = vld [vmem:[#allocation5 + $0xf4] sm:$0xf0]  ;;  %v3418_v19 = vld [vmem:[#allocation5 + $0x1e8] sm:$0xf] }
  0xfc   :  { %2027 = vmatpush.bf16.msrb.mxu3 %v3603_v30  ;;  %1990 = vmatpush.bf16.msrb.mxu0 %v3187_v34  ;;  %v3655_v30 = vor.u32 %v4081_v21, %v3652_v22  ;;  %v3239_v34 = vor.u32 %v3977_v24, %v3236_v25  ;;  %v4024_v21 = vld [vmem:[#allocation5 + $0x1f4] sm:$0xf0]  ;;  %v4029_v22 = vld [vmem:[#allocation5 + $0x224] sm:$0xf] }
  0xfd   :  { %2003 = vmatpush.bf16.msrb.mxu1 %v3315_v38  ;;  %v3973_v38 = vld [vmem:[#allocation5 + $0x64] sm:$0xf]  ;;  %v3419_v31 = vor.u32 %v4024_v21, %v3418_v19  ;;  %v4008_v19 = vld [vmem:[#allocation5 + $0x174] sm:$0xf0]  ;;  %v3498_v21 = vld [vmem:[#allocation5 + $0x288] sm:$0xf] }
  0xfe   :  { %v4061_v25 = vld [vmem:[#allocation5 + $0x324] sm:$0xf] }
  0xff   :  { %2015 = vmatpush.bf16.msrb.mxu2 %v3459_v42  ;;  %v3348_v42 = vld [vmem:[#allocation5 + $0x170] sm:$0xf0] }
 0x100   :  { %2028 = vmatpush.bf16.msrb.mxu3 %v3587_v46  ;;  %1991 = vmatpush.bf16.msrb.mxu0 %v3171_v50  ;;  %v3223_v46 = vor.u32 %v3973_v38, %v3220_v39  ;;  %v3351_v49 = vor.u32 %v4005_v41, %v3348_v42  ;;  %v3969_v50 = vld [vmem:[#allocation5 + $0x44] sm:$0xf]  ;;  %v3428_v39 = vld [vmem:[#allocation5 + $0x210] sm:$0xf0]  ;;  %v3546_v42 = vld [vmem:[#allocation5 + $0x2e8] sm:$0xf] }
 0x101   :  { %2004 = vmatpush.bf16.msrb.mxu1 %v3299_v53  ;;  %v4001_v53 = vld [vmem:[#allocation5 + $0x144] sm:$0xf]  ;;  %v3207_v58 = vor.u32 %v3969_v50, %v3204_v51  ;;  %v3556_v41 = vld [vmem:[#allocation5 + $0x310] sm:$0xf0]  ;;  %v3984_v50 = vld [vmem:[#allocation5 + $0xb4] sm:$0xf0] }
 0x102   :  { %v4025_v38 = vld [vmem:[#allocation5 + $0x204] sm:$0xf] }
 0x103   :  { %2016 = vmatpush.bf16.msrb.mxu2 %v3443_v57  ;;  %1992 = vmatmul.bf16.vlgmr.msrb.gmra.mxu0 %v4380_v0  ;;  %v3476_v57 = vld [vmem:[#allocation5 + $0x270] sm:$0xf0]  ;;  %v3431_v48 = vor.u32 %v4025_v38, %v3428_v39 }
 0x104   :  { %2036 = vmatpush.bf16.msra.mxu0 %v3287_v54  ;;  %2029 = vmatpush.bf16.msrb.mxu3 %v3571_v61  ;;  %v3332_v54 = vld [vmem:[#allocation5 + $0x150] sm:$0xf0] }
 0x105   :  { %2049 = vmatpush.bf16.msra.mxu1 %v3415_v56  ;;  %v4037_v56 = vld [vmem:[#allocation5 + $0x264] sm:$0xf]  ;;  %v3335_v61 = vor.u32 %v4001_v53, %v3332_v54  ;;  %v3386_v53 = vld [vmem:[#allocation5 + $0x1a8] sm:$0xf]  ;;  %v4016_v54 = vld [vmem:[#allocation5 + $0x1b4] sm:$0xf0] }
 0x106   :  { %2005 = vmatmul.bf16.vlgmr.msrb.gmra.mxu1 %v4382_v5  ;;  %v3479_v1 = vor.u32 %v4037_v56, %v3476_v57  ;;  %v3530_v56 = vld [vmem:[#allocation5 + $0x2c8] sm:$0xf]  ;;  %v4052_v57 = vld [vmem:[#allocation5 + $0x2d4] sm:$0xf0] }
 0x107   :  { %2017 = vmatpush.bf16.msrb.mxu2 %v3427_v10  ;;  %v3588_v10 = vld [vmem:[#allocation5 + $0x350] sm:$0xf0] }
 0x108   :  { %2037 = vmatpush.bf16.msra.mxu0 %v3271_v6  ;;  %2030 = vmatpush.bf16.msrb.mxu3 %v3555_v13  ;;  %v4033_v6 = vld [vmem:[#allocation5 + $0x244] sm:$0xf]  ;;  %v3172_v13 = vld [vmem:[#allocation5 + $0x10] sm:$0xf0] }
 0x109   :  { %2050 = vmatpush.bf16.msra.mxu1 %v3399_v9  ;;  %v4065_v9 = vld [vmem:[#allocation5 + $0x344] sm:$0xf]  ;;  %v3463_v16 = vor.u32 %v4033_v6, %v3460_v7  ;;  %v3175_v24 = vor.u32 %v3961_v11, %v3172_v13  ;;  %v3659_v6 = vor.u32 %v4084_v60, %v3658_v59  ;;  %v3514_v7 = vld [vmem:[#allocation5 + $0x2a8] sm:$0xf]  ;;  %v3964_v59 = vld [vmem:[#allocation5 + $0x14] sm:$0xf0] }
 0x10a   :  { %2018 = vmatmul.bf16.vlgmr.msrb.gmra.mxu2 %v4386_v27  ;;  %v3642_v11 = vld [vmem:[#allocation5 + $0x3a8] sm:$0xf] }
 0x10b   :  { %2062 = vmatpush.bf16.msra.mxu2 %v3543_v14  ;;  %2031 = vmatmul.bf16.vlgmr.msrb.gmra.mxu3 %v4388_v33  ;;  %v3993_v14 = vld [vmem:[#allocation5 + $0x104] sm:$0xf]  ;;  %v3306_v60 = vld [vmem:[#allocation5 + $0x108] sm:$0xf] }
 0x10c   :  { %2075 = vmatpush.bf16.msra.mxu3 %v3671_v17  ;;  %2038 = vmatpush.bf16.msra.mxu0 %v3255_v20  ;;  %v3290_v17 = vld [vmem:[#allocation5 + $0xe8] sm:$0xf]  ;;  %v3591_v20 = vor.u32 %v4065_v9, %v3588_v10  ;;  %v3303_v28 = vor.u32 %v3993_v14, %v3300_v15  ;;  %v3243_v10 = vor.u32 %v3980_v63, %v3242_v62  ;;  %v3990_v63 = vld [vmem:[#allocation5 + $0xec] sm:$0xf] }
 0x10d   :  { %2051 = vmatpush.bf16.msra.mxu1 %v3383_v23  ;;  %v3444_v23 = vld [vmem:[#allocation5 + $0x230] sm:$0xf0]  ;;  %v3291_v29 = vor.u32 %v3992_v18, %v3290_v17  ;;  %v3371_v14 = vor.u32 %v4012_v3, %v3370_v2  ;;  %v3226_v15 = vld [vmem:[#allocation5 + $0x68] sm:$0xf]  ;;  %v4022_v2 = vld [vmem:[#allocation5 + $0x1ec] sm:$0xf] }
 0x10e   :  { %v3447_v32 = vor.u32 %v4029_v22, %v3444_v23  ;;  %v3354_v18 = vld [vmem:[#allocation5 + $0x168] sm:$0xf]  ;;  %v4044_v22 = vld [vmem:[#allocation5 + $0x294] sm:$0xf0] }
 0x10f   :  { %2063 = vmatpush.bf16.msra.mxu2 %v3527_v26  ;;  %v3572_v26 = vld [vmem:[#allocation5 + $0x330] sm:$0xf0] }
 0x110   :  { %2076 = vmatpush.bf16.msra.mxu3 %v3655_v30  ;;  %2039 = vmatpush.bf16.msra.mxu0 %v3239_v34  ;;  %v3274_v30 = vld [vmem:[#allocation5 + $0xc8] sm:$0xf]  ;;  %v3988_v34 = vld [vmem:[#allocation5 + $0xd4] sm:$0xf0] }
 0x111   :  { %2052 = vmatpush.bf16.msra.mxu1 %v3367_v37  ;;  %v3575_v37 = vor.u32 %v4061_v25, %v3572_v26  ;;  %v3275_v44 = vor.u32 %v3988_v34, %v3274_v30  ;;  %v4076_v25 = vld [vmem:[#allocation5 + $0x394] sm:$0xf0]  ;;  %v3355_v26 = vor.u32 %v4008_v19, %v3354_v18  ;;  %v3499_v30 = vor.u32 %v4044_v22, %v3498_v21  ;;  %v4018_v21 = vld [vmem:[#allocation5 + $0x1cc] sm:$0xf]  ;;  %v3404_v22 = vld [vmem:[#allocation5 + $0x1d8] sm:$0xf0] }
 0x113   :  { %2064 = vmatpush.bf16.msra.mxu2 %v3511_v40  ;;  %v4057_v40 = vld [vmem:[#allocation5 + $0x304] sm:$0xf] }
 0x114   :  { %2077 = vmatpush.bf16.msra.mxu3 %v3639_v43  ;;  %2040 = vmatpush.bf16.msra.mxu0 %v3223_v46  ;;  %v4056_v43 = vld [vmem:[#allocation5 + $0x2f4] sm:$0xf0]  ;;  %v3559_v51 = vor.u32 %v4057_v40, %v3556_v41  ;;  %v3610_v40 = vld [vmem:[#allocation5 + $0x368] sm:$0xf] }
 0x115   :  { %2053 = vmatpush.bf16.msra.mxu1 %v3351_v49  ;;  %v4088_v46 = vld [vmem:[#allocation5 + $0x3f4] sm:$0xf0]  ;;  %v3258_v49 = vld [vmem:[#allocation5 + $0xa8] sm:$0xf] }
 0x116   :  { %v4072_v41 = vld [vmem:[#allocation5 + $0x374] sm:$0xf0] }
 0x117   :  { %2065 = vmatpush.bf16.msra.mxu2 %v3495_v52  ;;  %v3547_v52 = vor.u32 %v4056_v43, %v3546_v42  ;;  %v3194_v43 = vld [vmem:[#allocation5 + $0x28] sm:$0xf] }
 0x118   :  { %2078 = vmatpush.bf16.msra.mxu3 %v3623_v55  ;;  %2041 = vmatpush.bf16.msra.mxu0 %v3207_v58  ;;  %v3675_v55 = vor.u32 %v4088_v46, %v3674_v45  ;;  %v3259_v58 = vor.u32 %v3984_v50, %v3258_v49  ;;  %v3322_v46 = vld [vmem:[#allocation5 + $0x128] sm:$0xf]  ;;  %v4036_v50 = vld [vmem:[#allocation5 + $0x254] sm:$0xf0] }
 0x119   :  { %2054 = vmatpush.bf16.msra.mxu1 %v3335_v61  ;;  %v3387_v61 = vor.u32 %v4016_v54, %v3386_v53  ;;  %v3466_v49 = vld [vmem:[#allocation5 + $0x248] sm:$0xf]  ;;  %v4068_v54 = vld [vmem:[#allocation5 + $0x354] sm:$0xf0] }
 0x11a   :  { %v3594_v53 = vld [vmem:[#allocation5 + $0x348] sm:$0xf]  ;;  %v3467_v62 = vor.u32 %v4036_v50, %v3466_v49  ;;  %v3532_v49 = vld [vmem:[#allocation5 + $0x2d8] sm:$0xf0] }
 0x11b   :  { %2066 = vmatpush.bf16.msra.mxu2 %v3479_v1  ;;  %v3531_v1 = vor.u32 %v4052_v57, %v3530_v56 }
 0x11c   :  { %2079 = vmatpush.bf16.msra.mxu3 %v3607_v4  ;;  %2042 = vmatpush.bf16.msra.mxu0 %v3191_v8  ;;  %v4048_v8 = vld [vmem:[#allocation5 + $0x2b4] sm:$0xf0] }
 0x11d   :  { %2055 = vmatpush.bf16.msra.mxu1 %v3319_v12  ;;  %v4080_v12 = vld [vmem:[#allocation5 + $0x3b4] sm:$0xf0]  ;;  %v3515_v17 = vor.u32 %v4048_v8, %v3514_v7  ;;  %v3420_v7 = vld [vmem:[#allocation5 + $0x1f8] sm:$0xf0]  ;;  %v3450_v8 = vld [vmem:[#allocation5 + $0x228] sm:$0xf] }
 0x11e   :  { %v3423_v18 = vor.u32 %v4022_v2, %v3420_v7 }
 0x11f   :  { %2067 = vmatpush.bf16.msra.mxu2 %v3463_v16  ;;  %v1017_v4 = vpop.f32.mrf.mxu0  ;;  %v3976_v16 = vld [vmem:[#allocation5 + $0x74] sm:$0xf0] }
 0x120   :  { %2080 = vmatpush.bf16.msra.mxu3 %v3591_v20  ;;  %2043 = vmatpush.bf16.msra.mxu0 %v3175_v24  ;;  %v1030_v9 = vpop.f32.mrf.mxu1  ;;  %v3643_v20 = vor.u32 %v4080_v12, %v3642_v11  ;;  %v3227_v23 = vor.u32 %v3976_v16, %v3226_v15  ;;  %v3626_v24 = vld [vmem:[#allocation5 + $0x388] sm:$0xf] }
 0x121   :  { %2056 = vmatpush.bf16.msra.mxu1 %v3303_v28  ;;  %v1031_v13 = vadd.f32 %v1030_v9, %v1017_v4  ;;  %v3210_v28 = vld [vmem:[#allocation5 + $0x48] sm:$0xf]  ;;  %v3627_v35 = vor.u32 %v4076_v25, %v3626_v24  ;;  %v4032_v9 = vld [vmem:[#allocation5 + $0x234] sm:$0xf0] }
 0x122   :  { %v3578_v12 = vld [vmem:[#allocation5 + $0x328] sm:$0xf]  ;;  %v3451_v19 = vor.u32 %v4032_v9, %v3450_v8  ;;  %v4028_v25 = vld [vmem:[#allocation5 + $0x214] sm:$0xf0]  ;;  %v3974_v8 = vld [vmem:[#allocation5 + $0x6c] sm:$0xf] }
 0x123   :  { %2068 = vmatpush.bf16.msra.mxu2 %v3447_v32  ;;  %2044 = vmatmul.bf16.vlgmr.msra.gmra.mxu0 %v4380_v0  ;;  %v4004_v32 = vld [vmem:[#allocation5 + $0x154] sm:$0xf0]  ;;  %v3434_v24 = vld [vmem:[#allocation5 + $0x208] sm:$0xf]  ;;  %v3228_v9 = vld [vmem:[#allocation5 + $0x78] sm:$0xf0] }
 0x124   :  { %2088 = vmatpush.bf16.msrb.mxu0 %v3291_v29  ;;  %2081 = vmatpush.bf16.msra.mxu3 %v3575_v37  ;;  %v3972_v29 = vld [vmem:[#allocation5 + $0x54] sm:$0xf0] }
 0x125   :  { %2101 = vmatpush.bf16.msrb.mxu1 %v3419_v31  ;;  %v3338_v31 = vld [vmem:[#allocation5 + $0x148] sm:$0xf]  ;;  %v4040_v37 = vld [vmem:[#allocation5 + $0x274] sm:$0xf0]  ;;  %v3211_v39 = vor.u32 %v3972_v29, %v3210_v28 }
 0x126   :  { %2057 = vmatmul.bf16.vlgmr.msra.gmra.mxu1 %v4382_v5  ;;  %v3339_v42 = vor.u32 %v4004_v32, %v3338_v31  ;;  %v3483_v45 = vor.u32 %v4040_v37, %v3482_v36  ;;  %v4060_v29 = vld [vmem:[#allocation5 + $0x314] sm:$0xf0]  ;;  %v3548_v31 = vld [vmem:[#allocation5 + $0x2f8] sm:$0xf0]  ;;  %v3407_v37 = vor.u32 %v4018_v21, %v3404_v22 }
 0x127   :  { %2069 = vmatpush.bf16.msra.mxu2 %v3431_v48  ;;  %v1019_v34 = vpop.f32.mrf.mxu0  ;;  %v3611_v48 = vor.u32 %v4072_v41, %v3610_v40  ;;  %v3676_v36 = vld [vmem:[#allocation5 + $0x3f8] sm:$0xf0] }
 0x128   :  { %2089 = vmatpush.bf16.msrb.mxu0 %v3275_v44  ;;  %2082 = vmatpush.bf16.msra.mxu3 %v3559_v51  ;;  %v1032_v38 = vpop.f32.mrf.mxu1  ;;  %v3968_v44 = vld [vmem:[#allocation5 + $0x34] sm:$0xf0]  ;;  %v3260_v40 = vld [vmem:[#allocation5 + $0xb8] sm:$0xf0] }
 0x129   :  { %2102 = vmatpush.bf16.msrb.mxu1 %v3403_v47  ;;  %v4000_v47 = vld [vmem:[#allocation5 + $0x134] sm:$0xf0]  ;;  %v3435_v38 = vor.u32 %v4028_v25, %v3434_v24  ;;  %v3628_v21 = vld [vmem:[#allocation5 + $0x398] sm:$0xf0]  ;;  %v3970_v24 = vld [vmem:[#allocation5 + $0x4c] sm:$0xf] }
 0x12a   :  { %2070 = vmatmul.bf16.vlgmr.msra.gmra.mxu2 %v4386_v27  ;;  %v3212_v25 = vld [vmem:[#allocation5 + $0x58] sm:$0xf0] }
 0x12b   :  { %2114 = vmatpush.bf16.msrb.mxu2 %v3547_v52  ;;  %2083 = vmatmul.bf16.vlgmr.msra.gmra.mxu3 %v4388_v33  ;;  %v3195_v52 = vor.u32 %v3968_v44, %v3194_v43  ;;  %v4014_v44 = vld [vmem:[#allocation5 + $0x1ac] sm:$0xf] }
 0x12c   :  { %2127 = vmatpush.bf16.msrb.mxu3 %v3675_v55  ;;  %2090 = vmatpush.bf16.msrb.mxu0 %v3259_v58  ;;  %v3178_v55 = vld [vmem:[#allocation5 + $0x8] sm:$0xf]  ;;  %v3323_v58 = vor.u32 %v4000_v47, %v3322_v46 }
 0x12d   :  { %2103 = vmatpush.bf16.msrb.mxu1 %v3387_v61  ;;  %v1043_v51 = vpop.f32.mrf.mxu2  ;;  %v3996_v61 = vld [vmem:[#allocation5 + $0x114] sm:$0xf0]  ;;  %v3179_v11 = vor.u32 %v3964_v59, %v3178_v55  ;;  %v3244_v55 = vld [vmem:[#allocation5 + $0x98] sm:$0xf0] }
 0x12e   :  { %v1044_v56 = vadd.f32 %v1043_v51, %v1031_v13  ;;  %v1056_v57 = vpop.f32.mrf.mxu3  ;;  %v4064_v13 = vld [vmem:[#allocation5 + $0x334] sm:$0xf0]  ;;  %v3307_v15 = vor.u32 %v3996_v61, %v3306_v60  ;;  %v4082_v51 = vld [vmem:[#allocation5 + $0x3cc] sm:$0xf] }
 0x12f   :  { %2115 = vmatpush.bf16.msrb.mxu2 %v3531_v1  ;;  %v3292_v1 = vld [vmem:[#allocation5 + $0xf8] sm:$0xf0]  ;;  %v1069_v4 = vpop.f32.mrf.mxu0  ;;  %v4046_v61 = vld [vmem:[#allocation5 + $0x2ac] sm:$0xf] }
 0x130   :  { %2128 = vmatpush.bf16.msrb.mxu3 %v3659_v6  ;;  %2091 = vmatpush.bf16.msrb.mxu0 %v3243_v10  ;;  %v4412_v3 = vadd.f32 %v1056_v57, %v1044_v56  ;;  %v3595_v6 = vor.u32 %v4068_v54, %v3594_v53  ;;  %v1082_v10 = vpop.f32.mrf.mxu1  ;;  %v3295_v16 = vor.u32 %v3990_v63, %v3292_v1  ;;  %v3978_v54 = vld [vmem:[#allocation5 + $0x8c] sm:$0xf] }
 0x131   :  { %2104 = vmatpush.bf16.msrb.mxu1 %v3371_v14  ;;  %v4414_v14 = vadd.f32 %v1082_v10, %v1069_v4  ;;  %v4010_v57 = vld [vmem:[#allocation5 + $0x18c] sm:$0xf]  ;;  %v3247_v2 = vor.u32 %v3978_v54, %v3244_v55  ;;  %v3180_v55 = vld [vmem:[#allocation5 + $0x18] sm:$0xf0] }
 0x132   :  { %v4078_v4 = vld [vmem:[#allocation5 + $0x3ac] sm:$0xf] }
 0x133   :  { %2116 = vmatpush.bf16.msrb.mxu2 %v3515_v17  ;;  %v3986_v17 = vld [vmem:[#allocation5 + $0xcc] sm:$0xf] }
 0x134   :  { %2129 = vmatpush.bf16.msrb.mxu3 %v3643_v20  ;;  %2092 = vmatpush.bf16.msrb.mxu0 %v3227_v23  ;;  %v3276_v20 = vld [vmem:[#allocation5 + $0xd8] sm:$0xf0]  ;;  %v3579_v23 = vor.u32 %v4064_v13, %v3578_v12  ;;  %v4006_v12 = vld [vmem:[#allocation5 + $0x16c] sm:$0xf] }
 0x135   :  { %2105 = vmatpush.bf16.msrb.mxu1 %v3355_v26  ;;  %v3562_v26 = vld [vmem:[#allocation5 + $0x308] sm:$0xf]  ;;  %v1045_v28 = vpop.f32.mrf.mxu2  ;;  %v3279_v34 = vor.u32 %v3986_v17, %v3276_v20  ;;  %v3356_v13 = vld [vmem:[#allocation5 + $0x178] sm:$0xf0]  ;;  %v4074_v20 = vld [vmem:[#allocation5 + $0x38c] sm:$0xf] }
 0x136   :  { %v1058_v32 = vpop.f32.mrf.mxu3  ;;  %v3500_v17 = vld [vmem:[#allocation5 + $0x298] sm:$0xf0]  ;;  %v4002_v28 = vld [vmem:[#allocation5 + $0x14c] sm:$0xf] }
 0x137   :  { %2117 = vmatpush.bf16.msrb.mxu2 %v3499_v30  ;;  %v4054_v30 = vld [vmem:[#allocation5 + $0x2ec] sm:$0xf]  ;;  %v1071_v41 = vpop.f32.mrf.mxu0 }
 0x138   :  { %2130 = vmatpush.bf16.msrb.mxu3 %v3627_v35  ;;  %2093 = vmatpush.bf16.msrb.mxu0 %v3211_v39  ;;  %v4086_v35 = vld [vmem:[#allocation5 + $0x3ec] sm:$0xf]  ;;  %v3551_v43 = vor.u32 %v4054_v30, %v3548_v31  ;;  %v1084_v46 = vpop.f32.mrf.mxu1  ;;  %v3631_v31 = vor.u32 %v4074_v20, %v3628_v21  ;;  %v3196_v41 = vld [vmem:[#allocation5 + $0x38] sm:$0xf0]  ;;  %v4095_v21 = vld [vmem:[%s4561_s6 + $0x30] sm:$0xff] }
 0x139   :  { %2106 = vmatpush.bf16.msrb.mxu1 %v3339_v42  ;;  %v3982_v39 = vld [vmem:[#allocation5 + $0xac] sm:$0xf]  ;;  %v3563_v42 = vor.u32 %v4060_v29, %v3562_v26  ;;  %v3679_v47 = vor.u32 %v4086_v35, %v3676_v36  ;;  %v3340_v29 = vld [vmem:[#allocation5 + $0x158] sm:$0xf0]  ;;  %v3215_v36 = vor.u32 %v3970_v24, %v3212_v25 }
 0x13a   :  { %v3263_v50 = vor.u32 %v3982_v39, %v3260_v40  ;;  %v4038_v32 = vld [vmem:[#allocation5 + $0x26c] sm:$0xf]  ;;  %v3343_v39 = vor.u32 %v4002_v28, %v3340_v29  ;;  %v4092_v25 = vld [vmem:[%s4561_s6 + $0x18] sm:$0xff] }
 0x13b   :  { %2118 = vmatpush.bf16.msrb.mxu2 %v3483_v45  ;;  %v3388_v45 = vld [vmem:[#allocation5 + $0x1b8] sm:$0xf0]  ;;  %v3966_v40 = vld [vmem:[#allocation5 + $0x2c] sm:$0xf] }
 0x13c   :  { %2131 = vmatpush.bf16.msrb.mxu3 %v3611_v48  ;;  %2094 = vmatpush.bf16.msrb.mxu0 %v3195_v52  ;;  %v4050_v48 = vld [vmem:[#allocation5 + $0x2cc] sm:$0xf]  ;;  %v3660_v52 = vld [vmem:[#allocation5 + $0x3d8] sm:$0xf0]  ;;  %v3391_v53 = vor.u32 %v4014_v44, %v3388_v45 }
 0x13d   :  { %2107 = vmatpush.bf16.msrb.mxu1 %v3323_v58  ;;  %v3535_v56 = vor.u32 %v4050_v48, %v3532_v49  ;;  %v3372_v58 = vld [vmem:[#allocation5 + $0x198] sm:$0xf0]  ;;  %v1095_v59 = vpop.f32.mrf.mxu2  ;;  %v3663_v60 = vor.u32 %v4082_v51, %v3660_v52  ;;  %v4066_v51 = vld [vmem:[#allocation5 + $0x34c] sm:$0xf] }
 0x13e   :  { %v1096_v63 = vadd.f32 %v1095_v59, %v4414_v14  ;;  %v1108_v1 = vpop.f32.mrf.mxu3  ;;  %v3375_v7 = vor.u32 %v4010_v57, %v3372_v58  ;;  %v3324_v44 = vld [vmem:[#allocation5 + $0x138] sm:$0xf0]  ;;  %v3962_v54 = vld [vmem:[#allocation5 + $0xc] sm:$0xf] }
 0x13f   :  { %2119 = vmatpush.bf16.msrb.mxu2 %v3467_v62  ;;  %v3516_v62 = vld [vmem:[#allocation5 + $0x2b8] sm:$0xf0]  ;;  %v3994_v57 = vld [vmem:[#allocation5 + $0x10c] sm:$0xf] }
 0x140   :  { %2132 = vmatpush.bf16.msrb.mxu3 %v3595_v6  ;;  %2095 = vmatpush.bf16.msrb.mxu0 %v3179_v11  ;;  %v3644_v6 = vld [vmem:[#allocation5 + $0x3b8] sm:$0xf0]  ;;  %v4421_v10 = vadd.f32 %v1108_v1, %v1096_v63  ;;  %v3519_v11 = vor.u32 %v4046_v61, %v3516_v62  ;;  %v1121_v14 = vpop.f32.mrf.mxu0  ;;  %v3183_v1 = vor.u32 %v3962_v54, %v3180_v55 }
 0x141   :  { %2108 = vmatpush.bf16.msrb.mxu1 %v3307_v15  ;;  %v3647_v15 = vor.u32 %v4078_v4, %v3644_v6  ;;  %v3468_v48 = vld [vmem:[#allocation5 + $0x258] sm:$0xf0] }
 0x142   :  { %v3596_v52 = vld [vmem:[#allocation5 + $0x358] sm:$0xf0] }
 0x143   :  { %2120 = vmatpush.bf16.msrb.mxu2 %v3451_v19  ;;  %2096 = vmatmul.bf16.vlgmr.msrb.gmra.mxu0 %v4380_v0  ;;  %v3231_v19 = vor.u32 %v3974_v8, %v3228_v9  ;;  %v3308_v58 = vld [vmem:[#allocation5 + $0x118] sm:$0xf0]  ;;  %v3599_v59 = vor.u32 %v4066_v51, %v3596_v52  ;;  %v4098_v52 = vld [vmem:[%s4561_s6 + $0x48] sm:$0xff] }
 0x144   :  { %2140 = vmatpush.bf16.msra.mxu0 %v3295_v16  ;;  %2133 = vmatpush.bf16.msrb.mxu3 %v3579_v23  ;;  %v4042_v16 = vld [vmem:[#allocation5 + $0x28c] sm:$0xf]  ;;  %v3359_v23 = vor.u32 %v4006_v12, %v3356_v13  ;;  %v3452_v61 = vld [vmem:[#allocation5 + $0x238] sm:$0xf0] }
 0x145   :  { %2153 = vmatpush.bf16.msra.mxu1 %v3423_v18  ;;  %v1134_v18 = vpop.f32.mrf.mxu1  ;;  %v3503_v26 = vor.u32 %v4042_v16, %v3500_v17  ;;  %v1097_v30 = vpop.f32.mrf.mxu2  ;;  %v3580_v4 = vld [vmem:[#allocation5 + $0x338] sm:$0xf0]  ;;  %v4026_v12 = vld [vmem:[#allocation5 + $0x20c] sm:$0xf] }
 0x146   :  { %2109 = vmatmul.bf16.vlgmr.msrb.gmra.mxu1 %v4382_v5  ;;  %v1135_v22 = vadd.f32 %v1134_v18, %v1121_v14  ;;  %v1110_v35 = vpop.f32.mrf.mxu3  ;;  %v3436_v13 = vld [vmem:[#allocation5 + $0x218] sm:$0xf0]  ;;  %v4058_v14 = vld [vmem:[#allocation5 + $0x30c] sm:$0xf] }
 0x147   :  { %2121 = vmatpush.bf16.msrb.mxu2 %v3435_v38  ;;  %v3612_v38 = vld [vmem:[#allocation5 + $0x378] sm:$0xf0]  ;;  %v3439_v17 = vor.u32 %v4026_v12, %v3436_v13 }
 0x148   :  { %2141 = vmatpush.bf16.msra.mxu0 %v3279_v34  ;;  %2134 = vmatpush.bf16.msrb.mxu3 %v3563_v42  ;;  %v3484_v34 = vld [vmem:[#allocation5 + $0x278] sm:$0xf0]  ;;  %v1123_v45 = vpop.f32.mrf.mxu0 }
 0x149   :  { %2154 = vmatpush.bf16.msra.mxu1 %v3407_v37  ;;  %v4070_v37 = vld [vmem:[#allocation5 + $0x36c] sm:$0xf]  ;;  %v3487_v42 = vor.u32 %v4038_v32, %v3484_v34  ;;  %v4096_v16 = vld [vmem:[%s4561_s6 + $0x38] sm:$0xff]  ;;  %v4089_v34 = vld [vmem:[%s4561_s6] sm:$0xff] }
 0x14a   :  { %2122 = vmatmul.bf16.vlgmr.msrb.gmra.mxu2 %v4386_v27  ;;  %v3615_v46 = vor.u32 %v4070_v37, %v3612_v38  ;;  %v4104_v35 = vld [vmem:[%s4561_s6 + $0x78] sm:$0xff]  ;;  %v4103_v38 = vld [vmem:[%s4561_s6 + $0x70] sm:$0xff] }
 0x14b   :  { %2166 = vmatpush.bf16.msra.mxu2 %v3551_v43  ;;  %2135 = vmatmul.bf16.vlgmr.msrb.gmra.mxu3 %v4388_v33  ;;  %v3998_v43 = vld [vmem:[#allocation5 + $0x12c] sm:$0xf] }
 0x14c   :  { %2179 = vmatpush.bf16.msra.mxu3 %v3679_v47  ;;  %2142 = vmatpush.bf16.msra.mxu0 %v3263_v50  ;;  %v4034_v47 = vld [vmem:[#allocation5 + $0x24c] sm:$0xf]  ;;  %v3199_v50 = vor.u32 %v3966_v40, %v3196_v41  ;;  %v4101_v41 = vld [vmem:[%s4561_s6 + $0x60] sm:$0xff] }
 0x14d   :  { %2155 = vmatpush.bf16.msra.mxu1 %v3391_v53  ;;  %v1136_v49 = vpop.f32.mrf.mxu1  ;;  %v3327_v53 = vor.u32 %v3998_v43, %v3324_v44  ;;  %v1147_v62 = vpop.f32.mrf.mxu2  ;;  %v4100_v43 = vld [vmem:[%s4561_s6 + $0x58] sm:$0xff] }
 0x14e   :  { %v1160_v63 = vpop.f32.mrf.mxu3  ;;  %v1148_v6 = vadd.f32 %v1147_v62, %v1135_v22  ;;  %v4476_v49 = vld [vmem:[%s4560_s5] sm:$0xf]  ;;  %v4111_v62 = vld [vmem:[%s4561_s6 + $0xb0] sm:$0xff] }
 0x14f   :  { %2167 = vmatpush.bf16.msra.mxu2 %v3535_v56  ;;  %v3471_v56 = vor.u32 %v4034_v47, %v3468_v48  ;;  %v2198_v54 = vperm.slane %v4476_v49, 0 }
 0x150   :  { %2180 = vmatpush.bf16.msra.mxu3 %v3663_v60  ;;  %2143 = vmatpush.bf16.msra.mxu0 %v3247_v2  ;;  %v4030_v60 = vld [vmem:[#allocation5 + $0x22c] sm:$0xf]  ;;  %v4423_v9 = vadd.f32 %v1160_v63, %v1148_v6  ;;  %v4108_v6 = vld [vmem:[%s4561_s6 + $0x98] sm:$0xff] }
 0x151   :  { %2156 = vmatpush.bf16.msra.mxu1 %v3375_v7  ;;  %v4062_v2 = vld [vmem:[#allocation5 + $0x32c] sm:$0xf]  ;;  %v3311_v7 = vor.u32 %v3994_v57, %v3308_v58  ;;  %v3455_v8 = vor.u32 %v4030_v60, %v3452_v61  ;;  %v4112_v58 = vld [vmem:[%s4561_s6 + $0xb8] sm:$0xff] }
 0x153   :  { %2168 = vmatpush.bf16.msra.mxu2 %v3519_v11  ;;  %v3583_v11 = vor.u32 %v4062_v2, %v3580_v4  ;;  %v4109_v2 = vld [vmem:[%s4561_s6 + $0xa0] sm:$0xff] }
 0x154   :  { %2181 = vmatpush.bf16.msra.mxu3 %v3647_v15  ;;  %2144 = vmatpush.bf16.msra.mxu0 %v3231_v19  ;;  %v3564_v15 = vld [vmem:[#allocation5 + $0x318] sm:$0xf0] }
 0x155   :  { %2157 = vmatpush.bf16.msra.mxu1 %v3359_v23  ;;  %v3567_v18 = vor.u32 %v4058_v14, %v3564_v15  ;;  %v1149_v19 = vpop.f32.mrf.mxu2 }
 0x156   :  { %v1162_v20 = vpop.f32.mrf.mxu3 }
 0x157   :  { %2169 = vmatpush.bf16.msra.mxu2 %v3503_v26  ;;  %v4091_v26 = vld [vmem:[%s4561_s6 + $0x10] sm:$0xff]  ;;  %v4105_v20 = vld [vmem:[%s4561_s6 + $0x80] sm:$0xff] }
 0x158   :  { %2182 = vmatpush.bf16.msra.mxu3 %v3631_v31  ;;  %2145 = vmatpush.bf16.msra.mxu0 %v3215_v36  ;;  %v4090_v31 = vld [vmem:[%s4561_s6 + $0x8] sm:$0xff] }
 0x159   :  { %2158 = vmatpush.bf16.msra.mxu1 %v3343_v39  ;;  %v4102_v39 = vld [vmem:[%s4561_s6 + $0x68] sm:$0xff] }
 0x15b   :  { %2170 = vmatpush.bf16.msra.mxu2 %v3487_v42 }
 0x15c   :  { %2183 = vmatpush.bf16.msra.mxu3 %v3615_v46  ;;  %2146 = vmatpush.bf16.msra.mxu0 %v3199_v50  ;;  %v4099_v46 = vld [vmem:[%s4561_s6 + $0x50] sm:$0xff] }
 0x15d   :  { %2159 = vmatpush.bf16.msra.mxu1 %v3327_v53 }
 0x15f   :  { %2171 = vmatpush.bf16.msra.mxu2 %v3471_v56  ;;  %v4097_v56 = vld [vmem:[%s4561_s6 + $0x40] sm:$0xff] }
 0x160   :  { %2184 = vmatpush.bf16.msra.mxu3 %v3599_v59  ;;  %2147 = vmatpush.bf16.msra.mxu0 %v3183_v1  ;;  %v1173_v22 = vpop.f32.mrf.mxu0 }
 0x161   :  { %2160 = vmatpush.bf16.msra.mxu1 %v3311_v7 }
 0x163   :  { %2172 = vmatpush.bf16.msra.mxu2 %v3455_v8  ;;  %2148 = vmatmul.bf16.vlgmr.msra.gmra.mxu0 %v4380_v0  ;;  %v4094_v0 = vld [vmem:[%s4561_s6 + $0x28] sm:$0xff]  ;;  %v1186_v23 = vpop.f32.mrf.mxu1 }
 0x164   :  { %2185 = vmatpush.bf16.msra.mxu3 %v3583_v11  ;;  %2161 = vmatmul.bf16.vlgmr.msra.gmra.mxu1 %v4382_v5  ;;  %v4093_v5 = vld [vmem:[%s4561_s6 + $0x20] sm:$0xff]  ;;  %v1187_v24 = vadd.f32 %v1186_v23, %v1173_v22  ;;  %v4107_v11 = vld [vmem:[%s4561_s6 + $0x90] sm:$0xff] }
 0x165   :  { %2478 = vmatpush.bf16.msrb.mxu0 %v4096_v16  ;;  %2491 = vmatpush.bf16.msrb.mxu1 %v4104_v35  ;;  %v4106_v16 = vld [vmem:[%s4561_s6 + $0x88] sm:$0xff] }
 0x167   :  { %2173 = vmatpush.bf16.msra.mxu2 %v3439_v17 }
 0x168   :  { %2186 = vmatpush.bf16.msra.mxu3 %v3567_v18  ;;  %v2199_v18 = vperm.slane %v4476_v49, 1 }
 0x169   :  { %2479 = vmatpush.bf16.msrb.mxu0 %v4095_v21  ;;  %2492 = vmatpush.bf16.msrb.mxu1 %v4103_v38  ;;  %v4114_v38 = vld [vmem:[%s4561_s6 + $0xc8] sm:$0xff] }
 0x16a   :  { %2174 = vmatmul.bf16.vlgmr.msra.gmra.mxu2 %v4386_v27  ;;  %v1175_v27 = vpop.f32.mrf.mxu0 }
 0x16b   :  { %2187 = vmatmul.bf16.vlgmr.msra.gmra.mxu3 %v4388_v33  ;;  %v1188_v33 = vpop.f32.mrf.mxu1  ;;  %2504 = vmatpush.bf16.msrb.mxu2 %v4112_v58 }
 0x16c   :  { %v4117_v33 = vld [vmem:[%s4561_s6 + $0xe0] sm:$0xff] }
 0x16d   :  { %2480 = vmatpush.bf16.msrb.mxu0 %v4094_v0  ;;  %v1199_v28 = vpop.f32.mrf.mxu2  ;;  %2493 = vmatpush.bf16.msrb.mxu1 %v4102_v39  ;;  %v4120_v0 = vld [vmem:[%s4561_s6 + $0xf8] sm:$0xff] }
 0x16e   :  { %v1200_v29 = vadd.f32 %v1199_v28, %v1187_v24  ;;  %v1212_v30 = vpop.f32.mrf.mxu3  ;;  %2517 = vmatpush.bf16.msrb.mxu3 %v4120_v0  ;;  %v4119_v24 = vld [vmem:[%s4561_s6 + $0xf0] sm:$0xff]  ;;  %v4116_v28 = vld [vmem:[%s4561_s6 + $0xd8] sm:$0xff] }
 0x16f   :  { %2505 = vmatpush.bf16.msrb.mxu2 %v4111_v62 }
 0x170   :  { %v4450_v32 = vadd.f32 %v1212_v30, %v1200_v29 }
 0x171   :  { %2481 = vmatpush.bf16.msrb.mxu0 %v4093_v5  ;;  %2494 = vmatpush.bf16.msrb.mxu1 %v4101_v41 }
 0x172   :  { %2518 = vmatpush.bf16.msrb.mxu3 %v4119_v24 }
 0x175   :  { %2482 = vmatpush.bf16.msrb.mxu0 %v4092_v25  ;;  %v1201_v36 = vpop.f32.mrf.mxu2  ;;  %2495 = vmatpush.bf16.msrb.mxu1 %v4100_v43 }
 0x176   :  { %v1214_v37 = vpop.f32.mrf.mxu3 }
 0x179   :  { %2483 = vmatpush.bf16.msrb.mxu0 %v4091_v26  ;;  %2496 = vmatpush.bf16.msrb.mxu1 %v4099_v46 }
 0x17d   :  { %2484 = vmatpush.bf16.msrb.mxu0 %v4090_v31  ;;  %2497 = vmatpush.bf16.msrb.mxu1 %v4098_v52  ;;  %v4115_v31 = vld [vmem:[%s4561_s6 + $0xd0] sm:$0xff] }
 0x180   :  { %v1993_v40 = vpop.f32.mrf.mxu0 }
 0x181   :  { %2485 = vmatpush.bf16.msrb.mxu0 %v4089_v34  ;;  %2498 = vmatpush.bf16.msrb.mxu1 %v4097_v56 }
 0x183   :  { %v2006_v42 = vpop.f32.mrf.mxu1 }
 0x184   :  { %v2007_v47 = vadd.f32 %v2006_v42, %v1993_v40  ;;  %v2200_v40 = vperm.slane %v4476_v49, 2  ;;  %v4113_v42 = vld [vmem:[%s4561_s6 + $0xc0] sm:$0xff] }
 0x188   :  { %v1995_v44 = vpop.f32.mrf.mxu0 }
 0x18b   :  { %v2008_v45 = vpop.f32.mrf.mxu1 }
 0x18d   :  { %v2019_v48 = vpop.f32.mrf.mxu2 }
 0x18e   :  { %v2020_v50 = vadd.f32 %v2019_v48, %v2007_v47  ;;  %v2032_v51 = vpop.f32.mrf.mxu3 }
 0x190   :  { %v2033_v53 = vadd.f32 %v2032_v51, %v2020_v50 }
 0x192   :  { %v2192_v55 = vmax.f32 %v4412_v3, %v2033_v53  ;;  %v4110_v3 = vld [vmem:[%s4561_s6 + $0xa8] sm:$0xff] }
 0x193   :  { %2506 = vmatpush.bf16.msrb.mxu2 %v4110_v3 }
 0x194   :  { %v2206_v57 = vadd.f32 %v2198_v54, %v2192_v55 }
 0x195   :  { %v2021_v59 = vpop.f32.mrf.mxu2 }
 0x196   :  { %v2210_v60 = vmax.f32 %v2206_v57, 0.0  ;;  %v2034_v61 = vpop.f32.mrf.mxu3  ;;  %v2201_v57 = vperm.slane %v4476_v49, 3  ;;  %v4121_v49 = vld [vmem:[%s4563_s8] sm:$0xff] }
 0x197   :  { %2507 = vmatpush.bf16.msrb.mxu2 %v4109_v2 }
 0x198   :  { %v2214_v63 = vpack.c.bf16 %v2210_v60, %v2210_v60 }
 0x19a   :  { %2486 = vmatmul.bf16.vlgmr.msrb.gmra.mxu0 %v2214_v63 }
 0x19b   :  { %2508 = vmatpush.bf16.msrb.mxu2 %v4108_v6  ;;  %v4122_v6 = vld [vmem:[%s4563_s8 + $0x8] sm:$0xff]  ;;  %s4212_s8 = smov [#allocation7]  }
 0x19c   :  { %2562 = vmatpush.bf16.msra.mxu0 %v4122_v6  ;;  %s2575_s1 = sshll.u32 %s4212_s8, 4  ;;  %s2576_s1 = int_to_ptr.vmem [resolvable:$true] %s2575_s1 }
 0x19f   :  { %2509 = vmatpush.bf16.msrb.mxu2 %v4107_v11 }
 0x1a0   :  { %v2045_v1 = vpop.f32.mrf.mxu0  ;;  %2563 = vmatpush.bf16.msra.mxu0 %v4121_v49 }
 0x1a3   :  { %v2058_v4 = vpop.f32.mrf.mxu1  ;;  %2510 = vmatpush.bf16.msrb.mxu2 %v4106_v16 }
 0x1a4   :  { %v2059_v12 = vadd.f32 %v2058_v4, %v2045_v1 }
 0x1a7   :  { %2511 = vmatpush.bf16.msrb.mxu2 %v4105_v20 }
 0x1a8   :  { %v2047_v7 = vpop.f32.mrf.mxu0 }
 0x1ab   :  { %v2060_v8 = vpop.f32.mrf.mxu1 }
 0x1ac   :  { %v4128_v8 = vld [vmem:[%s4562_s7] ss:$0 sm:$0xff]  ;;  %s2577_s7 = sshll.u32 %s4565_s10, 4  ;;  %s2578_s7 = int_to_ptr.hbm [resolvable:$true] %s2577_s7 }
 0x1ad   :  { %v2071_v13 = vpop.f32.mrf.mxu2 }
 0x1ae   :  { %v2072_v14 = vadd.f32 %v2071_v13, %v2059_v12  ;;  %v2084_v15 = vpop.f32.mrf.mxu3 }
 0x1b0   :  { %v2085_v17 = vadd.f32 %v2084_v15, %v2072_v14 }
 0x1b2   :  { %v2193_v19 = vmax.f32 %v4421_v10, %v2085_v17  ;;  %v4118_v10 = vld [vmem:[%s4561_s6 + $0xe8] sm:$0xff] }
 0x1b3   :  { %2519 = vmatpush.bf16.msrb.mxu3 %v4118_v10 }
 0x1b4   :  { %v2207_v21 = vadd.f32 %v2199_v18, %v2193_v19  ;;  %v4129_v19 = vld [vmem:[%s4564_s9] ss:$0 sm:$0xff] }
 0x1b5   :  { %v2073_v22 = vpop.f32.mrf.mxu2 }
 0x1b6   :  { %v2211_v5 = vmax.f32 %v2207_v21, 0.0  ;;  %v2086_v23 = vpop.f32.mrf.mxu3 }
 0x1b7   :  { %2520 = vmatpush.bf16.msrb.mxu3 %v4117_v33 }
 0x1b8   :  { %v2215_v25 = vpack.c.bf16 %v2211_v5, %v2211_v5 }
 0x1ba   :  { %2499 = vmatmul.bf16.vlgmr.msrb.gmra.mxu1 %v2215_v25 }
 0x1bb   :  { %2521 = vmatpush.bf16.msrb.mxu3 %v4116_v28 }
 0x1bf   :  { %2522 = vmatpush.bf16.msrb.mxu3 %v4115_v31 }
 0x1c0   :  { %v2097_v27 = vpop.f32.mrf.mxu0 }
 0x1c3   :  { %v2110_v26 = vpop.f32.mrf.mxu1  ;;  %2523 = vmatpush.bf16.msrb.mxu3 %v4114_v38 }
 0x1c4   :  { %v2111_v34 = vadd.f32 %v2110_v26, %v2097_v27 }
 0x1c7   :  { %2524 = vmatpush.bf16.msrb.mxu3 %v4113_v42 }
 0x1c8   :  { %v2099_v29 = vpop.f32.mrf.mxu0 }
 0x1cb   :  { %v2112_v30 = vpop.f32.mrf.mxu1 }
 0x1cd   :  { %v2123_v35 = vpop.f32.mrf.mxu2 }
 0x1ce   :  { %v2124_v36 = vadd.f32 %v2123_v35, %v2111_v34  ;;  %v2136_v37 = vpop.f32.mrf.mxu3 }
 0x1d0   :  { %v2137_v39 = vadd.f32 %v2136_v37, %v2124_v36 }
 0x1d2   :  { %v2194_v41 = vmax.f32 %v4423_v9, %v2137_v39 }
 0x1d4   :  { %v2208_v43 = vadd.f32 %v2200_v40, %v2194_v41 }
 0x1d5   :  { %v2125_v44 = vpop.f32.mrf.mxu2 }
 0x1d6   :  { %v2212_v45 = vmax.f32 %v2208_v43, 0.0  ;;  %v2138_v46 = vpop.f32.mrf.mxu3 }
 0x1d8   :  { %v2216_v47 = vpack.c.bf16 %v2212_v45, %v2212_v45 }
 0x1da   :  { %2512 = vmatmul.bf16.vlgmr.msrb.gmra.mxu2 %v2216_v47 }
 0x1e0   :  { %v2149_v48 = vpop.f32.mrf.mxu0 }
 0x1e1   :  { %v2162_v50 = vpop.f32.mrf.mxu1 }
 0x1e2   :  { %v2163_v53 = vadd.f32 %v2162_v50, %v2149_v48 }
 0x1e8   :  { %v2151_v51 = vpop.f32.mrf.mxu0 }
 0x1e9   :  { %v2164_v52 = vpop.f32.mrf.mxu1 }
 0x1ed   :  { %v2175_v54 = vpop.f32.mrf.mxu2 }
 0x1ee   :  { %v2176_v55 = vadd.f32 %v2175_v54, %v2163_v53  ;;  %v2188_v56 = vpop.f32.mrf.mxu3 }
 0x1f0   :  { %v2189_v9 = vadd.f32 %v2188_v56, %v2176_v55 }
 0x1f2   :  { %v2195_v58 = vmax.f32 %v4450_v32, %v2189_v9 }
 0x1f4   :  { %v2209_v59 = vadd.f32 %v2201_v57, %v2195_v58 }
 0x1f5   :  { %v2177_v60 = vpop.f32.mrf.mxu2 }
 0x1f6   :  { %v2213_v61 = vmax.f32 %v2209_v59, 0.0  ;;  %v2190_v62 = vpop.f32.mrf.mxu3 }
 0x1f8   :  { %v2217_v63 = vpack.c.bf16 %v2213_v61, %v2213_v61 }
 0x1fa   :  { %2525 = vmatmul.bf16.vlgmr.msrb.gmra.mxu3 %v2217_v63 }
 0x217   :  { %v2487_v3 = vpop.f32.mrf.mxu0 }
 0x218   :  { %v2488_v11 = vadd.f32 %v4128_v8, %v2487_v3 }
 0x21f   :  { %v2489_v1 = vpop.f32.mrf.mxu0 }
 0x237   :  { %v2500_v2 = vpop.f32.mrf.mxu1 }
 0x238   :  { %v2501_v12 = vadd.f32 %v2500_v2, %v2488_v11 }
 0x23f   :  { %v2502_v4 = vpop.f32.mrf.mxu1 }
 0x25d   :  { %v2513_v32 = vpop.f32.mrf.mxu2 }
 0x25e   :  { %v2514_v13 = vadd.f32 %v2513_v32, %v2501_v12 }
 0x265   :  { %v2515_v7 = vpop.f32.mrf.mxu2 }
 0x27d   :  { %v2526_v14 = vpop.f32.mrf.mxu3 }
 0x27e   :  { %v2527_v15 = vadd.f32 %v2526_v14, %v2514_v13 }
 0x280   :  { %v2530_v16 = vmax.f32 %v2527_v15, 0.0 }
 0x282   :  { %v2531_v17 = vpack.c.bf16 %v2530_v16, %v2530_v16 }
 0x284   :  { %3816 = vmatmul.msk.bf16.vlgmr.msra.gmra.mxu0 %vm2552_vm1, %v2531_v17 }
 0x285   :  { %v2528_v18 = vpop.f32.mrf.mxu3 }
 0x301   :  { %v2565_v20 = vpop.f32.mrf.mxu0 }
 0x302   :  { %v2566_v21 = vadd.f32 %v4129_v19, %v2565_v20 }
 0x304   :  { %2569 = vst [vmem:[#allocation7] sm:$0xff] %v2566_v21 }
 0x305   :  { %2580 = dma.vmem_to_hbm [thread:$0]  %s2576_s1, 128, %s2578_s7, [#allocation4]  }
 0x309   :  { %v2567_v0 = vpop.f32.mrf.mxu0 }
 0x30a   :  { %4206 = dma.done.wait [#allocation4], 128  }
 0x30b   :  { %4207 = vsyncadd [#allocation4], 4294967168 }
 0x30c   :  { %2585 = vsyncpa [#allocation3], 1 }
 0x30d   :  { %2586 = vsyncpa [#allocation6], 1 }
 0x30e   :  { %2587 = vsyncpa [#allocation4], 1 }

</bundles_post_ra>
